<compile_context>
chip_gen: v6e
topology: v6e:2x2x1
jax: 0.10.0
libtpu: 0.0.40
codegen_flags: <defaults>
</compile_context>

<pallas_src>
import math
from functools import partial

import jax
import jax.numpy as jnp
from jax.experimental import pallas as pl
from jax.experimental.pallas import tpu as pltpu

_MASK_VAL = -1e30   # masked-score value (finite; exp underflows to 0 in f32)
_NEG_INIT = -1e9    # running-max init (kept well above _MASK_VAL)


def _vmem_limit_bytes():
    # ~75% of physical VMEM, capped: ~96 MiB on v5e/v6e, ~48 MiB on v7x.
    try:
        cap = pltpu.get_tpu_info().vmem_capacity_bytes
        return int(max(32 * 1024 * 1024, min(100 * 1024 * 1024, cap * 3 // 4)))
    except Exception:
        return 48 * 1024 * 1024


_VMEM_LIMIT = _vmem_limit_bytes()


# ------------------------------ helpers -------------------------------------

def _round_up(x, m):
    return ((x + m - 1) // m) * m


def _pad2d(a, rows, cols):
    r, c = a.shape
    if r == rows and c == cols:
        return a
    return jnp.pad(a, ((0, rows - r), (0, cols - c)))


def _pick_tile(dim, target, quantum):
    """Full dim if small, else the largest quantum-multiple <= target that
    divides dim (no padding), else the target (wrapper pads)."""
    if dim <= target:
        return dim
    t = (target // quantum) * quantum
    for cand in range(t, 0, -quantum):
        if dim % cand == 0:
            return cand
    return t if t > 0 else dim


def _pick_seq_tile(t, target):
    """Largest tile <= target that divides t and is sublane-friendly."""
    # NOTE: falls back to the full sequence for odd T (can be VMEM-heavy for
    # long, oddly-sized sequences — realistic T is a multiple of 8/128).
    if t <= target:
        return t
    for cand in range(min(t, target), 0, -1):
        if t % cand == 0 and cand % 8 == 0:
            return cand
    return t


# ------------- fused (LN) + matmul (+bias / GELU / residual) ----------------

def _linear_kernel(*refs, nk, has_ln, has_bias, has_res, act, eps):
    refs = list(refs)
    x_ref, w_ref = refs[0], refs[1]
    pos = 2
    if has_ln:
        g_ref, bln_ref = refs[pos], refs[pos + 1]
        pos += 2
    if has_bias:
        b_ref = refs[pos]
        pos += 1
    if has_res:
        r_ref = refs[pos]
        pos += 1
    o_ref = refs[pos]
    acc_ref = refs[pos + 1]
    xn_ref = refs[pos + 2] if has_ln else None

    j = pl.program_id(1)
    k = pl.program_id(2)

    @pl.when(k == 0)
    def _init():
        acc_ref[...] = jnp.zeros_like(acc_ref)

    if has_ln:
        # K is un-tiled here (nk == 1), so the LN statistics see the whole
        # feature row.  Normalize + bf16-cast once per row block (j == 0) into
        # a VMEM scratch and reuse it for every N tile (j axis is "arbitrary",
        # so the cache stays valid even with megacore splitting along i).
        @pl.when(jnp.logical_and(j == 0, k == 0))
        def _ln():
            xf = x_ref[...].astype(jnp.float32)
            mean = jnp.mean(xf, axis=-1, keepdims=True)
            var = jnp.mean(jnp.square(xf - mean), axis=-1, keepdims=True)
            xn = (xf - mean) * jax.lax.rsqrt(var + eps)
            xn = (xn * g_ref[...].astype(jnp.float32)
                  + bln_ref[...].astype(jnp.float32))
            xn_ref[...] = xn.astype(xn_ref.dtype)

        xv = xn_ref[...]                                   # bf16
    else:
        xv = x_ref[...].astype(jnp.bfloat16)

    # bf16 x bf16 -> f32 accumulation on the MXU.
    acc_ref[...] += jnp.dot(xv, w_ref[...].astype(jnp.bfloat16),
                            preferred_element_type=jnp.float32)

    @pl.when(k == nk - 1)
    def _finalize():
        y = acc_ref[...]
        if has_bias:
            y = y + b_ref[...].astype(jnp.float32)
        if act == "gelu":
            # TODO(synk): TransformerBlock internals were not specified;
            # tanh-GELU assumed (PyTorch nn.GELU default is the erf form).
            y = jax.nn.gelu(y, approximate=True)
        if has_res:
            y = y + r_ref[...].astype(jnp.float32)
        o_ref[...] = y.astype(o_ref.dtype)


def linear(x, w, b=None, *, residual=None, ln=None, act=None, out_dtype=None,
           tm=256, tn=512, tk=512, eps=1e-5):
    """y = [LN(x)] @ w [+ b] [-> gelu] [+ residual], tiled & pipelined."""
    M, K = x.shape
    Kw, N = w.shape
    assert K == Kw
    has_ln = ln is not None
    has_bias = b is not None
    has_res = residual is not None
    if out_dtype is None:
        out_dtype = residual.dtype if has_res else x.dtype

    tm_ = _pick_tile(M, tm, 8)
    tn_ = _pick_tile(N, tn, 128)
    tk_ = K if has_ln else _pick_tile(K, tk, 128)   # LN needs the full row
    Mp, Np, Kp = _round_up(M, tm_), _round_up(N, tn_), _round_up(K, tk_)
    nm, nn, nk = Mp // tm_, Np // tn_, Kp // tk_

    inputs = [_pad2d(x, Mp, Kp), _pad2d(w, Kp, Np)]
    in_specs = [
        pl.BlockSpec((tm_, tk_), lambda i, j, k: (i, k)),
        pl.BlockSpec((tk_, tn_), lambda i, j, k: (k, j)),
    ]
    if has_ln:
        gamma, beta = ln
        inputs += [gamma.reshape(1, K), beta.reshape(1, K)]
        in_specs += [pl.BlockSpec((1, K), lambda i, j, k: (0, 0)),
                     pl.BlockSpec((1, K), lambda i, j, k: (0, 0))]
    if has_bias:
        inputs.append(_pad2d(b.reshape(1, N), 1, Np))
        in_specs.append(pl.BlockSpec((1, tn_), lambda i, j, k: (0, j)))
    if has_res:
        inputs.append(_pad2d(residual, Mp, Np))
        in_specs.append(pl.BlockSpec((tm_, tn_), lambda i, j, k: (i, j)))

    scratch = [pltpu.VMEM((tm_, tn_), jnp.float32)]          # f32 accumulator
    if has_ln:
        scratch.append(pltpu.VMEM((tm_, Kp), jnp.bfloat16))  # LN'd row cache

    # With the LN cache the j axis must stay on one core (cache computed at
    # j == 0); without LN both i and j can be megacore-parallel.
    semantics = (("parallel", "arbitrary", "arbitrary") if has_ln
                 else ("parallel", "parallel", "arbitrary"))

    out = pl.pallas_call(
        partial(_linear_kernel, nk=nk, has_ln=has_ln, has_bias=has_bias,
                has_res=has_res, act=act, eps=eps),
        out_shape=jax.ShapeDtypeStruct((Mp, Np), out_dtype),
        grid_spec=pltpu.PrefetchScalarGridSpec(
            num_scalar_prefetch=0,
            grid=(nm, nn, nk),
            in_specs=in_specs,
            out_specs=pl.BlockSpec((tm_, tn_), lambda i, j, k: (i, j)),
            scratch_shapes=scratch,
        ),
        compiler_params=pltpu.CompilerParams(
            dimension_semantics=semantics,
            vmem_limit_bytes=_VMEM_LIMIT,
        ),
    )(*inputs)
    if Mp != M or Np != N:
        out = out[:M, :N]
    return out


# ----------------- fused LayerNorm + QKV projection (bf16 out) ---------------

def _ln_qkv_kernel(x_ref, g_ref, bln_ref, w_ref, b_ref, o_ref, xn_ref, *, eps):
    p = pl.program_id(1)
    d = pl.program_id(2)

    @pl.when(jnp.logical_and(p == 0, d == 0))
    def _ln():
        xf = x_ref[...].astype(jnp.float32)
        mean = jnp.mean(xf, axis=-1, keepdims=True)
        var = jnp.mean(jnp.square(xf - mean), axis=-1, keepdims=True)
        xn = (xf - mean) * jax.lax.rsqrt(var + eps)
        xn = (xn * g_ref[...].astype(jnp.float32)
              + bln_ref[...].astype(jnp.float32))
        xn_ref[...] = xn.astype(xn_ref.dtype)

    y = jnp.dot(xn_ref[...], w_ref[...].astype(jnp.bfloat16),
                preferred_element_type=jnp.float32)
    y = y + b_ref[...].astype(jnp.float32)
    o_ref[...] = y.astype(o_ref.dtype)


def ln_qkv_proj(x, gamma, beta, w3, b3, *, tm=256, tn=512, eps=1e-5):
    """(3, M, D) bf16 buffer = LayerNorm(x) @ W_{q,k,v} + b_{q,k,v}.

    w3 is (3, K, D) bf16 with the 1/sqrt(head_dim) scale already folded into
    the Q part; the output feeds the attention kernel directly (Q/K/V are
    D-wide blocks along the leading axis -> lane-dense, no copies).
    """
    M, K = x.shape
    P, Kw, D = w3.shape
    assert P == 3 and Kw == K
    tm_ = _pick_tile(M, tm, 8)
    tn_ = _pick_tile(D, tn, 128)
    if D % tn_ != 0:
        tn_ = D                     # keep the head/part layout un-padded
    Mp = _round_up(M, tm_)
    nm, nd = Mp // tm_, D // tn_

    return pl.pallas_call(
        partial(_ln_qkv_kernel, eps=eps),
        out_shape=jax.ShapeDtypeStruct((3, Mp, D), jnp.bfloat16),
        grid_spec=pltpu.PrefetchScalarGridSpec(
            num_scalar_prefetch=0,
            grid=(nm, 3, nd),
            in_specs=[
                pl.BlockSpec((tm_, K), lambda i, p, d: (i, 0)),
                pl.BlockSpec((1, K), lambda i, p, d: (0, 0)),
                pl.BlockSpec((1, K), lambda i, p, d: (0, 0)),
                pl.BlockSpec((None, K, tn_), lambda i, p, d: (p, 0, d)),
                pl.BlockSpec((None, 1, tn_), lambda i, p, d: (p, 0, d)),
            ],
            out_specs=pl.BlockSpec((None, tm_, tn_), lambda i, p, d: (p, i, d)),
            scratch_shapes=[pltpu.VMEM((tm_, K), jnp.bfloat16)],  # LN'd rows
        ),
        compiler_params=pltpu.CompilerParams(
            dimension_semantics=("parallel", "arbitrary", "arbitrary"),
            vmem_limit_bytes=_VMEM_LIMIT,
        ),
    )(_pad2d(x, Mp, K), gamma.reshape(1, K), beta.reshape(1, K), w3, b3)


# ------- fused flash-style causal MHA + out-projection + residual add --------

def _attn_kernel(q_ref, k_ref, v_ref, wo_ref, bo_ref, res_ref, o_ref,
                 m_ref, l_ref, acc_ref, *, n_heads, head_dim, nk):
    qi = pl.program_id(1)
    ki = pl.program_id(2)

    @pl.when(ki == 0)
    def _init():
        m_ref[...] = jnp.full_like(m_ref, _NEG_INIT)
        l_ref[...] = jnp.zeros_like(l_ref)
        acc_ref[...] = jnp.zeros_like(acc_ref)

    def _accumulate(with_mask):
        tq = q_ref.shape[0]
        tk = k_ref.shape[0]
        if with_mask:
            # tq == tk and this is the diagonal (ki == qi) tile, so the causal
            # predicate reduces to local col <= local row.
            causal = (jax.lax.broadcasted_iota(jnp.int32, (tq, tk), 1)
                      <= jax.lax.broadcasted_iota(jnp.int32, (tq, tk), 0))
        for h in range(n_heads):
            lo = h * head_dim
            hi = lo + head_dim
            q = q_ref[:, lo:hi]            # bf16; 1/sqrt(hd) folded into W_Q
            k = k_ref[:, lo:hi]
            v = v_ref[:, lo:hi]
            s = jax.lax.dot_general(q, k, (((1,), (1,)), ((), ())),
                                    preferred_element_type=jnp.float32)
            if with_mask:
                s = jnp.where(causal, s, _MASK_VAL)
            m_prev = m_ref[h]
            m_new = jnp.maximum(m_prev, jnp.max(s, axis=-1, keepdims=True))
            alpha = jnp.exp(m_prev - m_new)
            p = jnp.exp(s - m_new)
            l_ref[h] = alpha * l_ref[h] + jnp.sum(p, axis=-1, keepdims=True)
            acc_ref[:, lo:hi] = alpha * acc_ref[:, lo:hi] + jnp.dot(
                p.astype(jnp.bfloat16), v, preferred_element_type=jnp.float32)
            m_ref[h] = m_new

    # Interior tiles (fully below the diagonal): no mask / iota work needed.
    @pl.when(ki < qi)
    def _interior():
        _accumulate(False)

    # Diagonal tile: apply the causal mask.
    @pl.when(ki == qi)
    def _diag():
        _accumulate(True)

    # ki > qi tiles are fully masked: compute skipped here, and the KV
    # index_map is clamped in the wrapper so they issue no fresh DMA either.

    @pl.when(ki == nk - 1)
    def _finalize():
        # concat_h(softmax_h @ V_h) is laid out head-major along lanes in
        # acc_ref, so the output projection is ONE lane-dense (tq, D) @ (D, D)
        # MXU matmul fused with bias + residual; single lane-dense store.
        for h in range(n_heads):
            lo = h * head_dim
            hi = lo + head_dim
            acc_ref[:, lo:hi] = acc_ref[:, lo:hi] * pl.reciprocal(
                l_ref[h], approx=True)
        o = acc_ref[...].astype(jnp.bfloat16)
        y = res_ref[...].astype(jnp.float32) + bo_ref[...].astype(jnp.float32)
        y = y + jnp.dot(o, wo_ref[...].astype(jnp.bfloat16),
                        preferred_element_type=jnp.float32)
        o_ref[...] = y.astype(o_ref.dtype)


def attention_block(qkv, x_res, w_o, b_o, *, n_heads, batch, seq_len,
                    tq_target=256):
    """x_res + (causal-MHA(qkv) @ w_o + b_o).

    qkv: (3, M, D) bf16 (from ln_qkv_proj), x_res: (M, D) f32, out: (M, D) f32.
    """
    _, Mp, D = qkv.shape
    M, Dx = x_res.shape
    assert Dx == D and M == batch * seq_len and Mp >= M
    head_dim = D // n_heads
    tq = _pick_seq_tile(seq_len, tq_target)     # tk == tq by construction
    nq = seq_len // tq
    nk = nq

    # TODO(synk): W_O is held fully resident (bf16); for very large D on v7x
    # (64 MiB VMEM) it should additionally be tiled over its output dim.
    kernel = partial(_attn_kernel, n_heads=n_heads, head_dim=head_dim, nk=nk)
    return pl.pallas_call(
        kernel,
        out_shape=jax.ShapeDtypeStruct((M, D), x_res.dtype),
        grid_spec=pltpu.PrefetchScalarGridSpec(
            num_scalar_prefetch=0,
            grid=(batch, nq, nk),
            in_specs=[
                # Q / K / V are D-wide column blocks (parts 0/1/2) of the same
                # qkv buffer; KV block index is clamped to the causal diagonal
                # so fully-masked tiles re-use the resident block (no new DMA).
                pl.BlockSpec((None, tq, D),
                             lambda b, qi, ki: (0, b * nq + qi, 0)),
                pl.BlockSpec((None, tq, D),
                             lambda b, qi, ki: (1, b * nq + jnp.minimum(ki, qi), 0)),
                pl.BlockSpec((None, tq, D),
                             lambda b, qi, ki: (2, b * nq + jnp.minimum(ki, qi), 0)),
                pl.BlockSpec((D, D), lambda b, qi, ki: (0, 0)),
                pl.BlockSpec((1, D), lambda b, qi, ki: (0, 0)),
                pl.BlockSpec((tq, D), lambda b, qi, ki: (b * nq + qi, 0)),
            ],
            out_specs=pl.BlockSpec((tq, D), lambda b, qi, ki: (b * nq + qi, 0)),
            scratch_shapes=[
                pltpu.VMEM((n_heads, tq, 1), jnp.float32),   # running max
                pltpu.VMEM((n_heads, tq, 1), jnp.float32),   # running sum
                pltpu.VMEM((tq, D), jnp.float32),            # running PV
            ],
        ),
        compiler_params=pltpu.CompilerParams(
            dimension_semantics=("parallel", "parallel", "arbitrary"),
            vmem_limit_bytes=_VMEM_LIMIT,
        ),
    )(qkv, qkv, qkv, w_o, b_o, x_res)


# --------------------------- parameters & model ------------------------------

def sinusoidal_pe(seq_len, d_model):
    pos = jnp.arange(seq_len, dtype=jnp.float32)[:, None]
    i = jnp.arange(0, d_model, 2, dtype=jnp.float32)
    div = jnp.exp(-math.log(10000.0) * i / d_model)
    pe = jnp.zeros((seq_len, d_model), jnp.float32)
    pe = pe.at[:, 0::2].set(jnp.sin(pos * div))
    pe = pe.at[:, 1::2].set(jnp.cos(pos * div))
    return pe


def init_params(key, cfg):
    """Canonical f32 parameters (PyTorch-like layout)."""
    D, V, L = cfg["emb_dim"], cfg["vocab_size"], cfg["n_layers"]

    def normal(k, shape, std=0.02):
        return (std * jax.random.normal(k, shape)).astype(jnp.float32)

    keys = jax.random.split(key, 2 + L)
    tok_emb = normal(keys[0], (V, D))
    tok_emb = tok_emb.at[cfg["pad_idx"]].set(0.0)   # nn.Embedding padding_idx

    layers = []
    for l in range(L):
        lk = jax.random.split(keys[2 + l], 4)
        layers.append(dict(
            ln1_g=jnp.ones((D,), jnp.float32), ln1_b=jnp.zeros((D,), jnp.float32),
            w_qkv=normal(lk[0], (D, 3 * D)),   b_qkv=jnp.zeros((3 * D,), jnp.float32),
            w_o=normal(lk[1], (D, D)),         b_o=jnp.zeros((D,), jnp.float32),
            ln2_g=jnp.ones((D,), jnp.float32), ln2_b=jnp.zeros((D,), jnp.float32),
            w_ff1=normal(lk[2], (D, 4 * D)),   b_ff1=jnp.zeros((4 * D,), jnp.float32),
            w_ff2=normal(lk[3], (4 * D, D)),   b_ff2=jnp.zeros((D,), jnp.float32),
        ))

    return dict(
        tok_emb=tok_emb,
        pe=sinusoidal_pe(cfg["context_length"], D),
        layers=layers,
        final_g=jnp.ones((D,), jnp.float32),
        final_b=jnp.zeros((D,), jnp.float32),
        w_out=normal(keys[1], (D, V)),          # out_proj, bias=False
    )


def prepare_params(params, cfg):
    """One-time, off-the-hot-path weight prep: bf16 cast for all MXU-streamed
    weights, QKV weight split into (3, D, D) with 1/sqrt(hd) folded into W_Q,
    vocab padded to a lane-dense multiple of 128."""
    D, H, V = cfg["emb_dim"], cfg["n_heads"], cfg["vocab_size"]
    hd = D // H
    scale = 1.0 / math.sqrt(hd)

    layers = []
    for layer in params["layers"]:
        w3 = layer["w_qkv"].reshape(D, 3, D).transpose(1, 0, 2)   # (3, D, D)
        b3 = layer["b_qkv"].reshape(3, 1, D)
        w3 = w3.at[0].multiply(scale)       # fold attention scale into W_Q
        b3 = b3.at[0].multiply(scale)
        layers.append(dict(
            ln1_g=layer["ln1_g"], ln1_b=layer["ln1_b"],
            w_qkv3=w3.astype(jnp.bfloat16), b_qkv3=b3,
            w_o=layer["w_o"].astype(jnp.bfloat16),
            b_o=layer["b_o"].reshape(1, D),
            ln2_g=layer["ln2_g"], ln2_b=layer["ln2_b"],
            w_ff1=layer["w_ff1"].astype(jnp.bfloat16), b_ff1=layer["b_ff1"],
            w_ff2=layer["w_ff2"].astype(jnp.bfloat16), b_ff2=layer["b_ff2"],
        ))

    Vp = _round_up(V, 128)
    w_out = params["w_out"]
    if Vp != V:
        w_out = jnp.pad(w_out, ((0, 0), (0, Vp - V)))

    return dict(
        tok_emb=params["tok_emb"], pe=params["pe"], layers=layers,
        final_g=params["final_g"], final_b=params["final_b"],
        w_out=w_out.astype(jnp.bfloat16),
    )


def gpt_forward(params, token_idx, cfg):
    B, T = token_idx.shape
    D, H, V = cfg["emb_dim"], cfg["n_heads"], cfg["vocab_size"]

    # TokenEmbedding: learned table (pad row zeroed) * sqrt(D) + sinusoidal PE;
    # dropout layers are identity in eval mode.
    # TODO(synk): TokenEmbedding / TransformerBlock internals were not provided;
    # a standard pre-norm GPT block with sinusoidal PE is assumed.
    x = params["tok_emb"][token_idx] * math.sqrt(D) + params["pe"][:T][None]
    x = x.reshape(B * T, D).astype(jnp.float32)

    for layer in params["layers"]:
        # LayerNorm1 -> QKV projection (+bias), bf16 out          [1 pallas_call]
        qkv = ln_qkv_proj(x, layer["ln1_g"], layer["ln1_b"],
                          layer["w_qkv3"], layer["b_qkv3"])
        # flash causal MHA -> W_O (+bias) -> +residual            [1 pallas_call]
        x = attention_block(qkv, x, layer["w_o"], layer["b_o"],
                            n_heads=H, batch=B, seq_len=T)
        # LayerNorm2 -> FFN1 (+bias) -> GELU, bf16 out            [1 pallas_call]
        h = linear(x, layer["w_ff1"], layer["b_ff1"],
                   ln=(layer["ln2_g"], layer["ln2_b"]), act="gelu",
                   out_dtype=jnp.bfloat16)
        # FFN2 (+bias) -> +residual, f32 out                      [1 pallas_call]
        x = linear(h, layer["w_ff2"], layer["b_ff2"], residual=x)

    # final LayerNorm -> logits projection (no bias); wide lane-dense vocab tiles.
    logits = linear(x, params["w_out"],
                    ln=(params["final_g"], params["final_b"]), tn=1024)
    if logits.shape[-1] != V:
        logits = logits[:, :V]
    return logits.reshape(B, T, V)


# ------------------------- pure-JAX reference (check) ------------------------

def _ref_ln(x, g, b, eps=1e-5):
    mean = jnp.mean(x, axis=-1, keepdims=True)
    var = jnp.mean(jnp.square(x - mean), axis=-1, keepdims=True)
    return (x - mean) * jax.lax.rsqrt(var + eps) * g + b


def gpt_forward_ref(params, token_idx, cfg):
    B, T = token_idx.shape
    D, H = cfg["emb_dim"], cfg["n_heads"]
    hd = D // H
    x = params["tok_emb"][token_idx] * math.sqrt(D) + params["pe"][:T][None]
    for layer in params["layers"]:
        h = _ref_ln(x, layer["ln1_g"], layer["ln1_b"])
        qkv = h @ layer["w_qkv"] + layer["b_qkv"]
        q, k, v = jnp.split(qkv, 3, axis=-1)
        q = q.reshape(B, T, H, hd).transpose(0, 2, 1, 3)
        k = k.reshape(B, T, H, hd).transpose(0, 2, 1, 3)
        v = v.reshape(B, T, H, hd).transpose(0, 2, 1, 3)
        s = jnp.einsum("bhqd,bhkd->bhqk", q, k) / math.sqrt(hd)
        mask = jnp.tril(jnp.ones((T, T), bool))
        s = jnp.where(mask[None, None], s, -jnp.inf)
        p = jax.nn.softmax(s, axis=-1)
        a = jnp.einsum("bhqk,bhkd->bhqd", p, v)
        a = a.transpose(0, 2, 1, 3).reshape(B, T, D)
        x = x + a @ layer["w_o"] + layer["b_o"]
        h = _ref_ln(x, layer["ln2_g"], layer["ln2_b"])
        h = jax.nn.gelu(h @ layer["w_ff1"] + layer["b_ff1"], approximate=True)
        x = x + h @ layer["w_ff2"] + layer["b_ff2"]
    x = _ref_ln(x, params["final_g"], params["final_b"])
    return x @ params["w_out"]


# --------------------------------- main --------------------------------------

if __name__ == "__main__":
    cfg = dict(
        vocab_size=64,
        context_length=16,
        emb_dim=32,
        n_heads=4,
        n_layers=2,
        drop_rate=0.0,      # dropout is identity in eval-mode forward
        pad_idx=0,
    )
    B, T = 2, 8

    key = jax.random.PRNGKey(0)
    pkey, ikey = jax.random.split(key)
    params = init_params(pkey, cfg)
    kernel_params = prepare_params(params, cfg)
    token_idx = jax.random.randint(ikey, (B, T), 1, cfg["vocab_size"], jnp.int32)

    fwd = jax.jit(partial(gpt_forward, cfg=cfg))
    logits = fwd(kernel_params, token_idx)
    jax.block_until_ready(logits)

    assert logits.shape == (B, T, cfg["vocab_size"])
    assert bool(jnp.all(jnp.isfinite(logits)))

    ref = gpt_forward_ref(params, token_idx, cfg)
    assert bool(jnp.allclose(logits, ref, rtol=3e-2, atol=3e-2)), (
        "Pallas output diverges from the pure-JAX reference")

    print("KERNEL_OK")
</pallas_src>

<mosaic_0001>
module attributes {stable_mosaic.version = 11 : i64} {
  func.func @_linear_kernel(%arg0: i32, %arg1: i32, %arg2: i32, %arg3: memref<16x32xf32, #tpu.memory_space<vmem>>, %arg4: memref<32x128xbf16, #tpu.memory_space<vmem>>, %arg5: memref<1x32xf32, #tpu.memory_space<vmem>>, %arg6: memref<1x32xf32, #tpu.memory_space<vmem>>, %arg7: memref<1x128xf32, #tpu.memory_space<vmem>>, %arg8: memref<16x128xbf16, #tpu.memory_space<vmem>>, %arg9: memref<16x128xf32, #tpu.memory_space<vmem>>, %arg10: memref<16x32xbf16, #tpu.memory_space<vmem>>) attributes {dimension_semantics = [#tpu.dimension_semantics<parallel>, #tpu.dimension_semantics<arbitrary>, #tpu.dimension_semantics<arbitrary>], iteration_bounds = array<i64: 1, 1, 1>, scalar_prefetch = 0 : i64, scratch_operands = 2 : i64, tpu.core_type = #tpu.core_type<tc>, window_params = [{transform_indices = @transform_0, window_bounds = array<i64: 16, 32>}, {transform_indices = @transform_1, window_bounds = array<i64: 32, 128>}, {pipeline_mode = #tpu.pipeline_mode<synchronous>, transform_indices = @transform_2, window_bounds = array<i64: 1, 32>}, {pipeline_mode = #tpu.pipeline_mode<synchronous>, transform_indices = @transform_3, window_bounds = array<i64: 1, 32>}, {transform_indices = @transform_4, window_bounds = array<i64: 1, 128>}, {transform_indices = @transform_5, window_bounds = array<i64: 16, 128>}]} {
    %c0_i32 = arith.constant 0 : i32
    %0 = arith.cmpi eq, %arg2, %c0_i32 : i32
    %1 = arith.extui %0 : i1 to i32
    %c0_i32_0 = arith.constant 0 : i32
    %2 = arith.cmpi ne, %1, %c0_i32_0 : i32
    scf.if %2 {
      %cst_13 = arith.constant 0.000000e+00 : f32
      %17 = vector.broadcast %cst_13 : f32 to vector<16x128xf32>
      %c0_14 = arith.constant 0 : index
      %c0_15 = arith.constant 0 : index
      %18 = vector.load %arg9[%c0_14, %c0_15] : memref<16x128xf32, #tpu.memory_space<vmem>>, vector<16x128xf32>
      tpu.vector_store %arg9[%c0_14, %c0_15], %17 {strides = array<i32>} : memref<16x128xf32, #tpu.memory_space<vmem>>, vector<16x128xf32>,
    } else {
    }
    %c0_i32_1 = arith.constant 0 : i32
    %3 = arith.cmpi eq, %arg1, %c0_i32_1 : i32
    %c0_i32_2 = arith.constant 0 : i32
    %4 = arith.cmpi eq, %arg2, %c0_i32_2 : i32
    %5 = arith.andi %3, %4 : i1
    %6 = arith.extui %5 : i1 to i32
    %c0_i32_3 = arith.constant 0 : i32
    %7 = arith.cmpi ne, %6, %c0_i32_3 : i32
    scf.if %7 {
      %c0_13 = arith.constant 0 : index
      %c0_14 = arith.constant 0 : index
      %17 = vector.load %arg3[%c0_13, %c0_14] : memref<16x32xf32, #tpu.memory_space<vmem>>, vector<16x32xf32>
      %cst_15 = arith.constant dense<0.000000e+00> : vector<16xf32>
      %18 = vector.multi_reduction <add>, %17, %cst_15 [1] : vector<16x32xf32> to vector<16xf32>
      %19 = vector.shape_cast %18 : vector<16xf32> to vector<16x1xf32>
      %cst_16 = arith.constant 3.200000e+01 : f32
      %20 = vector.broadcast %cst_16 : f32 to vector<16x1xf32>
      %21 = arith.divf %19, %20 : vector<16x1xf32>
      %22 = vector.broadcast %21 : vector<16x1xf32> to vector<16x32xf32>
      %23 = arith.subf %17, %22 : vector<16x32xf32>
      %24 = arith.mulf %23, %23 : vector<16x32xf32>
      %cst_17 = arith.constant dense<0.000000e+00> : vector<16xf32>
      %25 = vector.multi_reduction <add>, %24, %cst_17 [1] : vector<16x32xf32> to vector<16xf32>
      %26 = vector.shape_cast %25 : vector<16xf32> to vector<16x1xf32>
      %cst_18 = arith.constant 3.200000e+01 : f32
      %27 = vector.broadcast %cst_18 : f32 to vector<16x1xf32>
      %28 = arith.divf %26, %27 : vector<16x1xf32>
      %29 = vector.broadcast %21 : vector<16x1xf32> to vector<16x32xf32>
      %30 = arith.subf %17, %29 : vector<16x32xf32>
      %cst_19 = arith.constant 9.99999974E-6 : f32
      %31 = vector.broadcast %cst_19 : f32 to vector<16x1xf32>
      %32 = arith.addf %28, %31 : vector<16x1xf32>
      %33 = math.rsqrt %32 : vector<16x1xf32>
      %34 = vector.broadcast %33 : vector<16x1xf32> to vector<16x32xf32>
      %35 = arith.mulf %30, %34 : vector<16x32xf32>
      %c0_20 = arith.constant 0 : index
      %c0_21 = arith.constant 0 : index
      %36 = vector.load %arg5[%c0_20, %c0_21] : memref<1x32xf32, #tpu.memory_space<vmem>>, vector<1x32xf32>
      %37 = vector.broadcast %36 : vector<1x32xf32> to vector<16x32xf32>
      %38 = arith.mulf %35, %37 : vector<16x32xf32>
      %c0_22 = arith.constant 0 : index
      %c0_23 = arith.constant 0 : index
      %39 = vector.load %arg6[%c0_22, %c0_23] : memref<1x32xf32, #tpu.memory_space<vmem>>, vector<1x32xf32>
      %40 = vector.broadcast %39 : vector<1x32xf32> to vector<16x32xf32>
      %41 = arith.addf %38, %40 : vector<16x32xf32>
      %42 = arith.truncf %41 : vector<16x32xf32> to vector<16x32xbf16>
      %c0_24 = arith.constant 0 : index
      %c0_25 = arith.constant 0 : index
      %43 = vector.load %arg10[%c0_24, %c0_25] : memref<16x32xbf16, #tpu.memory_space<vmem>>, vector<16x32xbf16>
      tpu.vector_store %arg10[%c0_24, %c0_25], %42 {strides = array<i32>} : memref<16x32xbf16, #tpu.memory_space<vmem>>, vector<16x32xbf16>,
    } else {
    }
    %c0 = arith.constant 0 : index
    %c0_4 = arith.constant 0 : index
    %8 = vector.load %arg10[%c0, %c0_4] : memref<16x32xbf16, #tpu.memory_space<vmem>>, vector<16x32xbf16>
    %c0_5 = arith.constant 0 : index
    %c0_6 = arith.constant 0 : index
    %9 = vector.load %arg9[%c0_5, %c0_6] : memref<16x128xf32, #tpu.memory_space<vmem>>, vector<16x128xf32>
    %c0_7 = arith.constant 0 : index
    %c0_8 = arith.constant 0 : index
    %10 = vector.load %arg4[%c0_7, %c0_8] : memref<32x128xbf16, #tpu.memory_space<vmem>>, vector<32x128xbf16>
    %cst = arith.constant dense<0.000000e+00> : vector<16x128xf32>
    %11 = tpu.matmul %8, %10, %cst {dimension_numbers = #tpu.dot_dimension_numbers<[1], [0], [0], [1], [0, 0, 1, 1], [], []>} : vector<16x32xbf16>, vector<32x128xbf16>, vector<16x128xf32> -> vector<16x128xf32>
    %12 = arith.addf %9, %11 : vector<16x128xf32>
    %c0_9 = arith.constant 0 : index
    %c0_10 = arith.constant 0 : index
    %13 = vector.load %arg9[%c0_9, %c0_10] : memref<16x128xf32, #tpu.memory_space<vmem>>, vector<16x128xf32>
    tpu.vector_store %arg9[%c0_9, %c0_10], %12 {strides = array<i32>} : memref<16x128xf32, #tpu.memory_space<vmem>>, vector<16x128xf32>,
    %c0_i32_11 = arith.constant 0 : i32
    %14 = arith.cmpi eq, %arg2, %c0_i32_11 : i32
    %15 = arith.extui %14 : i1 to i32
    %c0_i32_12 = arith.constant 0 : i32
    %16 = arith.cmpi ne, %15, %c0_i32_12 : i32
    scf.if %16 {
      %c0_13 = arith.constant 0 : index
      %c0_14 = arith.constant 0 : index
      %17 = vector.load %arg9[%c0_13, %c0_14] : memref<16x128xf32, #tpu.memory_space<vmem>>, vector<16x128xf32>
      %c0_15 = arith.constant 0 : index
      %c0_16 = arith.constant 0 : index
      %18 = vector.load %arg7[%c0_15, %c0_16] : memref<1x128xf32, #tpu.memory_space<vmem>>, vector<1x128xf32>
      %19 = vector.broadcast %18 : vector<1x128xf32> to vector<16x128xf32>
      %20 = arith.addf %17, %19 : vector<16x128xf32>
      %21 = arith.mulf %20, %20 : vector<16x128xf32>
      %22 = arith.mulf %20, %21 : vector<16x128xf32>
      %cst_17 = arith.constant 4.471500e-02 : f32
      %23 = vector.broadcast %cst_17 : f32 to vector<16x128xf32>
      %24 = arith.mulf %23, %22 : vector<16x128xf32>
      %25 = arith.addf %20, %24 : vector<16x128xf32>
      %cst_18 = arith.constant 0.797884583 : f32
      %26 = vector.broadcast %cst_18 : f32 to vector<16x128xf32>
      %27 = arith.mulf %26, %25 : vector<16x128xf32>
      %28 = math.tanh %27 : vector<16x128xf32>
      %cst_19 = arith.constant 1.000000e+00 : f32
      %29 = vector.broadcast %cst_19 : f32 to vector<16x128xf32>
      %30 = arith.addf %29, %28 : vector<16x128xf32>
      %cst_20 = arith.constant 5.000000e-01 : f32
      %31 = vector.broadcast %cst_20 : f32 to vector<16x128xf32>
      %32 = arith.mulf %31, %30 : vector<16x128xf32>
      %33 = arith.mulf %20, %32 : vector<16x128xf32>
      %34 = arith.truncf %33 : vector<16x128xf32> to vector<16x128xbf16>
      %c0_21 = arith.constant 0 : index
      %c0_22 = arith.constant 0 : index
      %35 = vector.load %arg8[%c0_21, %c0_22] : memref<16x128xbf16, #tpu.memory_space<vmem>>, vector<16x128xbf16>
      tpu.vector_store %arg8[%c0_21, %c0_22], %34 {strides = array<i32>} : memref<16x128xbf16, #tpu.memory_space<vmem>>, vector<16x128xbf16>,
    } else {
    }
    return
  }
  func.func @transform_0(%arg0: i32, %arg1: i32, %arg2: i32) -> (i32, i32) {
    %c0_i32 = arith.constant 0 : i32
    return %arg0, %arg2 : i32, i32
  }
  func.func @transform_1(%arg0: i32, %arg1: i32, %arg2: i32) -> (i32, i32) {
    %c0_i32 = arith.constant 0 : i32
    return %arg2, %arg1 : i32, i32
  }
  func.func @transform_2(%arg0: i32, %arg1: i32, %arg2: i32) -> (i32, i32) {
    %c0_i32 = arith.constant 0 : i32
    %c0_i32_0 = arith.constant 0 : i32
    %c0_i32_1 = arith.constant 0 : i32
    return %c0_i32, %c0_i32_0 : i32, i32
  }
  func.func @transform_3(%arg0: i32, %arg1: i32, %arg2: i32) -> (i32, i32) {
    %c0_i32 = arith.constant 0 : i32
    %c0_i32_0 = arith.constant 0 : i32
    %c0_i32_1 = arith.constant 0 : i32
    return %c0_i32, %c0_i32_0 : i32, i32
  }
  func.func @transform_4(%arg0: i32, %arg1: i32, %arg2: i32) -> (i32, i32) {
    %c0_i32 = arith.constant 0 : i32
    %c0_i32_0 = arith.constant 0 : i32
    return %c0_i32, %arg1 : i32, i32
  }
  func.func @transform_5(%arg0: i32, %arg1: i32, %arg2: i32) -> (i32, i32) {
    %c0_i32 = arith.constant 0 : i32
    return %arg0, %arg1 : i32, i32
  }
}

module attributes {stable_mosaic.version = 11 : i64} {
  func.func @_linear_kernel(%arg0: i32, %arg1: i32, %arg2: i32, %arg3: memref<16x128xbf16, #tpu.memory_space<vmem>>, %arg4: memref<128x32xbf16, #tpu.memory_space<vmem>>, %arg5: memref<1x32xf32, #tpu.memory_space<vmem>>, %arg6: memref<16x32xf32, #tpu.memory_space<vmem>>, %arg7: memref<16x32xf32, #tpu.memory_space<vmem>>, %arg8: memref<16x32xf32, #tpu.memory_space<vmem>>) attributes {dimension_semantics = [#tpu.dimension_semantics<parallel>, #tpu.dimension_semantics<parallel>, #tpu.dimension_semantics<arbitrary>], iteration_bounds = array<i64: 1, 1, 1>, scalar_prefetch = 0 : i64, scratch_operands = 1 : i64, tpu.core_type = #tpu.core_type<tc>, window_params = [{transform_indices = @transform_0, window_bounds = array<i64: 16, 128>}, {transform_indices = @transform_1, window_bounds = array<i64: 128, 32>}, {transform_indices = @transform_2, window_bounds = array<i64: 1, 32>}, {transform_indices = @transform_3, window_bounds = array<i64: 16, 32>}, {transform_indices = @transform_4, window_bounds = array<i64: 16, 32>}]} {
    %c0_i32 = arith.constant 0 : i32
    %0 = arith.cmpi eq, %arg2, %c0_i32 : i32
    %1 = arith.extui %0 : i1 to i32
    %c0_i32_0 = arith.constant 0 : i32
    %2 = arith.cmpi ne, %1, %c0_i32_0 : i32
    scf.if %2 {
      %cst_10 = arith.constant 0.000000e+00 : f32
      %12 = vector.broadcast %cst_10 : f32 to vector<16x32xf32>
      %c0_11 = arith.constant 0 : index
      %c0_12 = arith.constant 0 : index
      %13 = vector.load %arg8[%c0_11, %c0_12] : memref<16x32xf32, #tpu.memory_space<vmem>>, vector<16x32xf32>
      tpu.vector_store %arg8[%c0_11, %c0_12], %12 {strides = array<i32>} : memref<16x32xf32, #tpu.memory_space<vmem>>, vector<16x32xf32>,
    } else {
    }
    %c0 = arith.constant 0 : index
    %c0_1 = arith.constant 0 : index
    %3 = vector.load %arg3[%c0, %c0_1] : memref<16x128xbf16, #tpu.memory_space<vmem>>, vector<16x128xbf16>
    %c0_2 = arith.constant 0 : index
    %c0_3 = arith.constant 0 : index
    %4 = vector.load %arg8[%c0_2, %c0_3] : memref<16x32xf32, #tpu.memory_space<vmem>>, vector<16x32xf32>
    %c0_4 = arith.constant 0 : index
    %c0_5 = arith.constant 0 : index
    %5 = vector.load %arg4[%c0_4, %c0_5] : memref<128x32xbf16, #tpu.memory_space<vmem>>, vector<128x32xbf16>
    %cst = arith.constant dense<0.000000e+00> : vector<16x32xf32>
    %6 = tpu.matmul %3, %5, %cst {dimension_numbers = #tpu.dot_dimension_numbers<[1], [0], [0], [1], [0, 0, 1, 1], [], []>} : vector<16x128xbf16>, vector<128x32xbf16>, vector<16x32xf32> -> vector<16x32xf32>
    %7 = arith.addf %4, %6 : vector<16x32xf32>
    %c0_6 = arith.constant 0 : index
    %c0_7 = arith.constant 0 : index
    %8 = vector.load %arg8[%c0_6, %c0_7] : memref<16x32xf32, #tpu.memory_space<vmem>>, vector<16x32xf32>
    tpu.vector_store %arg8[%c0_6, %c0_7], %7 {strides = array<i32>} : memref<16x32xf32, #tpu.memory_space<vmem>>, vector<16x32xf32>,
    %c0_i32_8 = arith.constant 0 : i32
    %9 = arith.cmpi eq, %arg2, %c0_i32_8 : i32
    %10 = arith.extui %9 : i1 to i32
    %c0_i32_9 = arith.constant 0 : i32
    %11 = arith.cmpi ne, %10, %c0_i32_9 : i32
    scf.if %11 {
      %c0_10 = arith.constant 0 : index
      %c0_11 = arith.constant 0 : index
      %12 = vector.load %arg8[%c0_10, %c0_11] : memref<16x32xf32, #tpu.memory_space<vmem>>, vector<16x32xf32>
      %c0_12 = arith.constant 0 : index
      %c0_13 = arith.constant 0 : index
      %13 = vector.load %arg5[%c0_12, %c0_13] : memref<1x32xf32, #tpu.memory_space<vmem>>, vector<1x32xf32>
      %14 = vector.broadcast %13 : vector<1x32xf32> to vector<16x32xf32>
      %15 = arith.addf %12, %14 : vector<16x32xf32>
      %c0_14 = arith.constant 0 : index
      %c0_15 = arith.constant 0 : index
      %16 = vector.load %arg6[%c0_14, %c0_15] : memref<16x32xf32, #tpu.memory_space<vmem>>, vector<16x32xf32>
      %17 = arith.addf %15, %16 : vector<16x32xf32>
      %c0_16 = arith.constant 0 : index
      %c0_17 = arith.constant 0 : index
      %18 = vector.load %arg7[%c0_16, %c0_17] : memref<16x32xf32, #tpu.memory_space<vmem>>, vector<16x32xf32>
      tpu.vector_store %arg7[%c0_16, %c0_17], %17 {strides = array<i32>} : memref<16x32xf32, #tpu.memory_space<vmem>>, vector<16x32xf32>,
    } else {
    }
    return
  }
  func.func @transform_0(%arg0: i32, %arg1: i32, %arg2: i32) -> (i32, i32) {
    %c0_i32 = arith.constant 0 : i32
    return %arg0, %arg2 : i32, i32
  }
  func.func @transform_1(%arg0: i32, %arg1: i32, %arg2: i32) -> (i32, i32) {
    %c0_i32 = arith.constant 0 : i32
    return %arg2, %arg1 : i32, i32
  }
  func.func @transform_2(%arg0: i32, %arg1: i32, %arg2: i32) -> (i32, i32) {
    %c0_i32 = arith.constant 0 : i32
    %c0_i32_0 = arith.constant 0 : i32
    return %c0_i32, %arg1 : i32, i32
  }
  func.func @transform_3(%arg0: i32, %arg1: i32, %arg2: i32) -> (i32, i32) {
    %c0_i32 = arith.constant 0 : i32
    return %arg0, %arg1 : i32, i32
  }
  func.func @transform_4(%arg0: i32, %arg1: i32, %arg2: i32) -> (i32, i32) {
    %c0_i32 = arith.constant 0 : i32
    return %arg0, %arg1 : i32, i32
  }
}

module attributes {stable_mosaic.version = 11 : i64} {
  func.func @_ln_qkv_kernel(%arg0: i32, %arg1: i32, %arg2: i32, %arg3: memref<16x32xf32, #tpu.memory_space<vmem>>, %arg4: memref<1x32xf32, #tpu.memory_space<vmem>>, %arg5: memref<1x32xf32, #tpu.memory_space<vmem>>, %arg6: memref<1x32x32xbf16, #tpu.memory_space<vmem>>, %arg7: memref<1x1x32xf32, #tpu.memory_space<vmem>>, %arg8: memref<1x16x32xbf16, #tpu.memory_space<vmem>>, %arg9: memref<16x32xbf16, #tpu.memory_space<vmem>>) attributes {dimension_semantics = [#tpu.dimension_semantics<parallel>, #tpu.dimension_semantics<arbitrary>, #tpu.dimension_semantics<arbitrary>], iteration_bounds = array<i64: 1, 3, 1>, scalar_prefetch = 0 : i64, scratch_operands = 1 : i64, tpu.core_type = #tpu.core_type<tc>, window_params = [{transform_indices = @transform_0, window_bounds = array<i64: 16, 32>}, {pipeline_mode = #tpu.pipeline_mode<synchronous>, transform_indices = @transform_1, window_bounds = array<i64: 1, 32>}, {pipeline_mode = #tpu.pipeline_mode<synchronous>, transform_indices = @transform_2, window_bounds = array<i64: 1, 32>}, {transform_indices = @transform_3, window_bounds = array<i64: 1, 32, 32>}, {transform_indices = @transform_4, window_bounds = array<i64: 1, 1, 32>}, {transform_indices = @transform_5, window_bounds = array<i64: 1, 16, 32>}]} {
    %c0_i32 = arith.constant 0 : i32
    %0 = arith.cmpi eq, %arg1, %c0_i32 : i32
    %c0_i32_0 = arith.constant 0 : i32
    %1 = arith.cmpi eq, %arg2, %c0_i32_0 : i32
    %2 = arith.andi %0, %1 : i1
    %3 = arith.extui %2 : i1 to i32
    %c0_i32_1 = arith.constant 0 : i32
    %4 = arith.cmpi ne, %3, %c0_i32_1 : i32
    scf.if %4 {
      %c0_12 = arith.constant 0 : index
      %c0_13 = arith.constant 0 : index
      %17 = vector.load %arg3[%c0_12, %c0_13] : memref<16x32xf32, #tpu.memory_space<vmem>>, vector<16x32xf32>
      %cst_14 = arith.constant dense<0.000000e+00> : vector<16xf32>
      %18 = vector.multi_reduction <add>, %17, %cst_14 [1] : vector<16x32xf32> to vector<16xf32>
      %19 = vector.shape_cast %18 : vector<16xf32> to vector<16x1xf32>
      %cst_15 = arith.constant 3.200000e+01 : f32
      %20 = vector.broadcast %cst_15 : f32 to vector<16x1xf32>
      %21 = arith.divf %19, %20 : vector<16x1xf32>
      %22 = vector.broadcast %21 : vector<16x1xf32> to vector<16x32xf32>
      %23 = arith.subf %17, %22 : vector<16x32xf32>
      %24 = arith.mulf %23, %23 : vector<16x32xf32>
      %cst_16 = arith.constant dense<0.000000e+00> : vector<16xf32>
      %25 = vector.multi_reduction <add>, %24, %cst_16 [1] : vector<16x32xf32> to vector<16xf32>
      %26 = vector.shape_cast %25 : vector<16xf32> to vector<16x1xf32>
      %cst_17 = arith.constant 3.200000e+01 : f32
      %27 = vector.broadcast %cst_17 : f32 to vector<16x1xf32>
      %28 = arith.divf %26, %27 : vector<16x1xf32>
      %29 = vector.broadcast %21 : vector<16x1xf32> to vector<16x32xf32>
      %30 = arith.subf %17, %29 : vector<16x32xf32>
      %cst_18 = arith.constant 9.99999974E-6 : f32
      %31 = vector.broadcast %cst_18 : f32 to vector<16x1xf32>
      %32 = arith.addf %28, %31 : vector<16x1xf32>
      %33 = math.rsqrt %32 : vector<16x1xf32>
      %34 = vector.broadcast %33 : vector<16x1xf32> to vector<16x32xf32>
      %35 = arith.mulf %30, %34 : vector<16x32xf32>
      %c0_19 = arith.constant 0 : index
      %c0_20 = arith.constant 0 : index
      %36 = vector.load %arg4[%c0_19, %c0_20] : memref<1x32xf32, #tpu.memory_space<vmem>>, vector<1x32xf32>
      %37 = vector.broadcast %36 : vector<1x32xf32> to vector<16x32xf32>
      %38 = arith.mulf %35, %37 : vector<16x32xf32>
      %c0_21 = arith.constant 0 : index
      %c0_22 = arith.constant 0 : index
      %39 = vector.load %arg5[%c0_21, %c0_22] : memref<1x32xf32, #tpu.memory_space<vmem>>, vector<1x32xf32>
      %40 = vector.broadcast %39 : vector<1x32xf32> to vector<16x32xf32>
      %41 = arith.addf %38, %40 : vector<16x32xf32>
      %42 = arith.truncf %41 : vector<16x32xf32> to vector<16x32xbf16>
      %c0_23 = arith.constant 0 : index
      %c0_24 = arith.constant 0 : index
      %43 = vector.load %arg9[%c0_23, %c0_24] : memref<16x32xbf16, #tpu.memory_space<vmem>>, vector<16x32xbf16>
      tpu.vector_store %arg9[%c0_23, %c0_24], %42 {strides = array<i32>} : memref<16x32xbf16, #tpu.memory_space<vmem>>, vector<16x32xbf16>,
    } else {
    }
    %c0 = arith.constant 0 : index
    %c0_2 = arith.constant 0 : index
    %5 = vector.load %arg9[%c0, %c0_2] : memref<16x32xbf16, #tpu.memory_space<vmem>>, vector<16x32xbf16>
    %c0_3 = arith.constant 0 : index
    %c0_4 = arith.constant 0 : index
    %c0_5 = arith.constant 0 : index
    %6 = vector.load %arg6[%c0_3, %c0_4, %c0_5] : memref<1x32x32xbf16, #tpu.memory_space<vmem>>, vector<1x32x32xbf16>
    %7 = vector.shape_cast %6 : vector<1x32x32xbf16> to vector<32x32xbf16>
    %cst = arith.constant dense<0.000000e+00> : vector<16x32xf32>
    %8 = tpu.matmul %5, %7, %cst {dimension_numbers = #tpu.dot_dimension_numbers<[1], [0], [0], [1], [0, 0, 1, 1], [], []>} : vector<16x32xbf16>, vector<32x32xbf16>, vector<16x32xf32> -> vector<16x32xf32>
    %c0_6 = arith.constant 0 : index
    %c0_7 = arith.constant 0 : index
    %c0_8 = arith.constant 0 : index
    %9 = vector.load %arg7[%c0_6, %c0_7, %c0_8] : memref<1x1x32xf32, #tpu.memory_space<vmem>>, vector<1x1x32xf32>
    %10 = vector.shape_cast %9 : vector<1x1x32xf32> to vector<1x32xf32>
    %11 = vector.broadcast %10 : vector<1x32xf32> to vector<16x32xf32>
    %12 = arith.addf %8, %11 : vector<16x32xf32>
    %13 = arith.truncf %12 : vector<16x32xf32> to vector<16x32xbf16>
    %c0_9 = arith.constant 0 : index
    %c0_10 = arith.constant 0 : index
    %c0_11 = arith.constant 0 : index
    %14 = vector.load %arg8[%c0_9, %c0_10, %c0_11] : memref<1x16x32xbf16, #tpu.memory_space<vmem>>, vector<1x16x32xbf16>
    %15 = vector.shape_cast %14 : vector<1x16x32xbf16> to vector<16x32xbf16>
    %16 = vector.shape_cast %13 : vector<16x32xbf16> to vector<1x16x32xbf16>
    tpu.vector_store %arg8[%c0_9, %c0_10, %c0_11], %16 {strides = array<i32>} : memref<1x16x32xbf16, #tpu.memory_space<vmem>>, vector<1x16x32xbf16>,
    return
  }
  func.func @transform_0(%arg0: i32, %arg1: i32, %arg2: i32) -> (i32, i32) {
    %c0_i32 = arith.constant 0 : i32
    %c0_i32_0 = arith.constant 0 : i32
    return %arg0, %c0_i32 : i32, i32
  }
  func.func @transform_1(%arg0: i32, %arg1: i32, %arg2: i32) -> (i32, i32) {
    %c0_i32 = arith.constant 0 : i32
    %c0_i32_0 = arith.constant 0 : i32
    %c0_i32_1 = arith.constant 0 : i32
    return %c0_i32, %c0_i32_0 : i32, i32
  }
  func.func @transform_2(%arg0: i32, %arg1: i32, %arg2: i32) -> (i32, i32) {
    %c0_i32 = arith.constant 0 : i32
    %c0_i32_0 = arith.constant 0 : i32
    %c0_i32_1 = arith.constant 0 : i32
    return %c0_i32, %c0_i32_0 : i32, i32
  }
  func.func @transform_3(%arg0: i32, %arg1: i32, %arg2: i32) -> (i32, i32, i32) {
    %c0_i32 = arith.constant 0 : i32
    %c0_i32_0 = arith.constant 0 : i32
    return %arg1, %c0_i32, %arg2 : i32, i32, i32
  }
  func.func @transform_4(%arg0: i32, %arg1: i32, %arg2: i32) -> (i32, i32, i32) {
    %c0_i32 = arith.constant 0 : i32
    %c0_i32_0 = arith.constant 0 : i32
    return %arg1, %c0_i32, %arg2 : i32, i32, i32
  }
  func.func @transform_5(%arg0: i32, %arg1: i32, %arg2: i32) -> (i32, i32, i32) {
    %c0_i32 = arith.constant 0 : i32
    return %arg1, %arg0, %arg2 : i32, i32, i32
  }
}

module attributes {stable_mosaic.version = 11 : i64} {
  func.func @_attn_kernel(%arg0: i32, %arg1: i32, %arg2: i32, %arg3: memref<1x8x32xbf16, #tpu.memory_space<vmem>>, %arg4: memref<1x8x32xbf16, #tpu.memory_space<vmem>>, %arg5: memref<1x8x32xbf16, #tpu.memory_space<vmem>>, %arg6: memref<32x32xbf16, #tpu.memory_space<vmem>>, %arg7: memref<1x32xf32, #tpu.memory_space<vmem>>, %arg8: memref<8x32xf32, #tpu.memory_space<vmem>>, %arg9: memref<8x32xf32, #tpu.memory_space<vmem>>, %arg10: memref<4x8x1xf32, #tpu.memory_space<vmem>>, %arg11: memref<4x8x1xf32, #tpu.memory_space<vmem>>, %arg12: memref<8x32xf32, #tpu.memory_space<vmem>>) attributes {dimension_semantics = [#tpu.dimension_semantics<parallel>, #tpu.dimension_semantics<parallel>, #tpu.dimension_semantics<arbitrary>], iteration_bounds = array<i64: 2, 1, 1>, scalar_prefetch = 0 : i64, scratch_operands = 3 : i64, tpu.core_type = #tpu.core_type<tc>, window_params = [{transform_indices = @transform_0, window_bounds = array<i64: 1, 8, 32>}, {transform_indices = @transform_1, window_bounds = array<i64: 1, 8, 32>}, {transform_indices = @transform_2, window_bounds = array<i64: 1, 8, 32>}, {pipeline_mode = #tpu.pipeline_mode<synchronous>, transform_indices = @transform_3, window_bounds = array<i64: 32, 32>}, {pipeline_mode = #tpu.pipeline_mode<synchronous>, transform_indices = @transform_4, window_bounds = array<i64: 1, 32>}, {transform_indices = @transform_5, window_bounds = array<i64: 8, 32>}, {transform_indices = @transform_6, window_bounds = array<i64: 8, 32>}]} {
    %c0_i32 = arith.constant 0 : i32
    %0 = arith.cmpi eq, %arg2, %c0_i32 : i32
    %1 = arith.extui %0 : i1 to i32
    %c0_i32_0 = arith.constant 0 : i32
    %2 = arith.cmpi ne, %1, %c0_i32_0 : i32
    scf.if %2 {
      %cst = arith.constant -1.000000e+09 : f32
      %12 = vector.broadcast %cst : f32 to vector<4x8x1xf32>
      %c0 = arith.constant 0 : index
      %c0_5 = arith.constant 0 : index
      %c0_6 = arith.constant 0 : index
      %13 = vector.load %arg10[%c0, %c0_5, %c0_6] : memref<4x8x1xf32, #tpu.memory_space<vmem>>, vector<4x8x1xf32>
      tpu.vector_store %arg10[%c0, %c0_5, %c0_6], %12 {strides = array<i32>} : memref<4x8x1xf32, #tpu.memory_space<vmem>>, vector<4x8x1xf32>,
      %cst_7 = arith.constant 0.000000e+00 : f32
      %14 = vector.broadcast %cst_7 : f32 to vector<4x8x1xf32>
      %c0_8 = arith.constant 0 : index
      %c0_9 = arith.constant 0 : index
      %c0_10 = arith.constant 0 : index
      %15 = vector.load %arg11[%c0_8, %c0_9, %c0_10] : memref<4x8x1xf32, #tpu.memory_space<vmem>>, vector<4x8x1xf32>
      tpu.vector_store %arg11[%c0_8, %c0_9, %c0_10], %14 {strides = array<i32>} : memref<4x8x1xf32, #tpu.memory_space<vmem>>, vector<4x8x1xf32>,
      %cst_11 = arith.constant 0.000000e+00 : f32
      %16 = vector.broadcast %cst_11 : f32 to vector<8x32xf32>
      %c0_12 = arith.constant 0 : index
      %c0_13 = arith.constant 0 : index
      %17 = vector.load %arg12[%c0_12, %c0_13] : memref<8x32xf32, #tpu.memory_space<vmem>>, vector<8x32xf32>
      tpu.vector_store %arg12[%c0_12, %c0_13], %16 {strides = array<i32>} : memref<8x32xf32, #tpu.memory_space<vmem>>, vector<8x32xf32>,
    } else {
    }
    %3 = arith.cmpi slt, %arg2, %arg1 : i32
    %4 = arith.extui %3 : i1 to i32
    %c0_i32_1 = arith.constant 0 : i32
    %5 = arith.cmpi ne, %4, %c0_i32_1 : i32
    scf.if %5 {
      %c0 = arith.constant 0 : index
      %c0_5 = arith.constant 0 : index
      %c0_6 = arith.constant 0 : index
      %12 = vector.load %arg3[%c0, %c0_5, %c0_6] : memref<1x8x32xbf16, #tpu.memory_space<vmem>>, vector<1x8x8xbf16>
      %13 = vector.shape_cast %12 : vector<1x8x8xbf16> to vector<8x8xbf16>
      %c0_7 = arith.constant 0 : index
      %c0_8 = arith.constant 0 : index
      %c0_9 = arith.constant 0 : index
      %14 = vector.load %arg4[%c0_7, %c0_8, %c0_9] : memref<1x8x32xbf16, #tpu.memory_space<vmem>>, vector<1x8x8xbf16>
      %15 = vector.shape_cast %14 : vector<1x8x8xbf16> to vector<8x8xbf16>
      %c0_10 = arith.constant 0 : index
      %c0_11 = arith.constant 0 : index
      %c0_12 = arith.constant 0 : index
      %16 = vector.load %arg5[%c0_10, %c0_11, %c0_12] : memref<1x8x32xbf16, #tpu.memory_space<vmem>>, vector<1x8x8xbf16>
      %17 = vector.shape_cast %16 : vector<1x8x8xbf16> to vector<8x8xbf16>
      %cst = arith.constant dense<0.000000e+00> : vector<8x8xf32>
      %18 = tpu.matmul %13, %15, %cst {dimension_numbers = #tpu.dot_dimension_numbers<[1], [1], [0], [0], [0, 0, 1, 0], [], []>} : vector<8x8xbf16>, vector<8x8xbf16>, vector<8x8xf32> -> vector<8x8xf32>
      %c0_13 = arith.constant 0 : index
      %c0_14 = arith.constant 0 : index
      %c0_15 = arith.constant 0 : index
      %19 = vector.load %arg10[%c0_13, %c0_14, %c0_15] : memref<4x8x1xf32, #tpu.memory_space<vmem>>, vector<1x8x1xf32>
      %20 = vector.shape_cast %19 : vector<1x8x1xf32> to vector<8x1xf32>
      %cst_16 = arith.constant dense<0xFF800000> : vector<8xf32>
      %21 = vector.multi_reduction <maximumf>, %18, %cst_16 [1] : vector<8x8xf32> to vector<8xf32>
      %22 = vector.shape_cast %21 : vector<8xf32> to vector<8x1xf32>
      %23 = arith.maximumf %20, %22 : vector<8x1xf32>
      %24 = arith.subf %20, %23 : vector<8x1xf32>
      %25 = math.exp %24 : vector<8x1xf32>
      %26 = vector.broadcast %23 : vector<8x1xf32> to vector<8x8xf32>
      %27 = arith.subf %18, %26 : vector<8x8xf32>
      %28 = math.exp %27 : vector<8x8xf32>
      %c0_17 = arith.constant 0 : index
      %c0_18 = arith.constant 0 : index
      %c0_19 = arith.constant 0 : index
      %29 = vector.load %arg11[%c0_17, %c0_18, %c0_19] : memref<4x8x1xf32, #tpu.memory_space<vmem>>, vector<1x8x1xf32>
      %30 = vector.shape_cast %29 : vector<1x8x1xf32> to vector<8x1xf32>
      %31 = arith.mulf %25, %30 : vector<8x1xf32>
      %cst_20 = arith.constant dense<0.000000e+00> : vector<8xf32>
      %32 = vector.multi_reduction <add>, %28, %cst_20 [1] : vector<8x8xf32> to vector<8xf32>
      %33 = vector.shape_cast %32 : vector<8xf32> to vector<8x1xf32>
      %34 = arith.addf %31, %33 : vector<8x1xf32>
      %c0_21 = arith.constant 0 : index
      %c0_22 = arith.constant 0 : index
      %c0_23 = arith.constant 0 : index
      %35 = vector.load %arg11[%c0_21, %c0_22, %c0_23] : memref<4x8x1xf32, #tpu.memory_space<vmem>>, vector<1x8x1xf32>
      %36 = vector.shape_cast %35 : vector<1x8x1xf32> to vector<8x1xf32>
      %37 = vector.shape_cast %34 : vector<8x1xf32> to vector<1x8x1xf32>
      tpu.vector_store %arg11[%c0_21, %c0_22, %c0_23], %37 {strides = array<i32>} : memref<4x8x1xf32, #tpu.memory_space<vmem>>, vector<1x8x1xf32>,
      %c0_24 = arith.constant 0 : index
      %c0_25 = arith.constant 0 : index
      %38 = vector.load %arg12[%c0_24, %c0_25] : memref<8x32xf32, #tpu.memory_space<vmem>>, vector<8x8xf32>
      %39 = vector.broadcast %25 : vector<8x1xf32> to vector<8x8xf32>
      %40 = arith.mulf %39, %38 : vector<8x8xf32>
      %41 = arith.truncf %28 : vector<8x8xf32> to vector<8x8xbf16>
      %cst_26 = arith.constant dense<0.000000e+00> : vector<8x8xf32>
      %42 = tpu.matmul %41, %17, %cst_26 {dimension_numbers = #tpu.dot_dimension_numbers<[1], [0], [0], [1], [0, 0, 1, 1], [], []>} : vector<8x8xbf16>, vector<8x8xbf16>, vector<8x8xf32> -> vector<8x8xf32>
      %43 = arith.addf %40, %42 : vector<8x8xf32>
      %c0_27 = arith.constant 0 : index
      %c0_28 = arith.constant 0 : index
      %44 = vector.load %arg12[%c0_27, %c0_28] : memref<8x32xf32, #tpu.memory_space<vmem>>, vector<8x8xf32>
      tpu.vector_store %arg12[%c0_27, %c0_28], %43 {strides = array<i32>} : memref<8x32xf32, #tpu.memory_space<vmem>>, vector<8x8xf32>,
      %c0_29 = arith.constant 0 : index
      %c0_30 = arith.constant 0 : index
      %c0_31 = arith.constant 0 : index
      %45 = vector.load %arg10[%c0_29, %c0_30, %c0_31] : memref<4x8x1xf32, #tpu.memory_space<vmem>>, vector<1x8x1xf32>
      %46 = vector.shape_cast %45 : vector<1x8x1xf32> to vector<8x1xf32>
      %47 = vector.shape_cast %23 : vector<8x1xf32> to vector<1x8x1xf32>
      tpu.vector_store %arg10[%c0_29, %c0_30, %c0_31], %47 {strides = array<i32>} : memref<4x8x1xf32, #tpu.memory_space<vmem>>, vector<1x8x1xf32>,
      %c0_32 = arith.constant 0 : index
      %c0_33 = arith.constant 0 : index
      %c8 = arith.constant 8 : index
      %48 = vector.load %arg3[%c0_32, %c0_33, %c8] : memref<1x8x32xbf16, #tpu.memory_space<vmem>>, vector<1x8x8xbf16>
      %49 = vector.shape_cast %48 : vector<1x8x8xbf16> to vector<8x8xbf16>
      %c0_34 = arith.constant 0 : index
      %c0_35 = arith.constant 0 : index
      %c8_36 = arith.constant 8 : index
      %50 = vector.load %arg4[%c0_34, %c0_35, %c8_36] : memref<1x8x32xbf16, #tpu.memory_space<vmem>>, vector<1x8x8xbf16>
      %51 = vector.shape_cast %50 : vector<1x8x8xbf16> to vector<8x8xbf16>
      %c0_37 = arith.constant 0 : index
      %c0_38 = arith.constant 0 : index
      %c8_39 = arith.constant 8 : index
      %52 = vector.load %arg5[%c0_37, %c0_38, %c8_39] : memref<1x8x32xbf16, #tpu.memory_space<vmem>>, vector<1x8x8xbf16>
      %53 = vector.shape_cast %52 : vector<1x8x8xbf16> to vector<8x8xbf16>
      %cst_40 = arith.constant dense<0.000000e+00> : vector<8x8xf32>
      %54 = tpu.matmul %49, %51, %cst_40 {dimension_numbers = #tpu.dot_dimension_numbers<[1], [1], [0], [0], [0, 0, 1, 0], [], []>} : vector<8x8xbf16>, vector<8x8xbf16>, vector<8x8xf32> -> vector<8x8xf32>
      %c1 = arith.constant 1 : index
      %c0_41 = arith.constant 0 : index
      %c0_42 = arith.constant 0 : index
      %55 = vector.load %arg10[%c1, %c0_41, %c0_42] : memref<4x8x1xf32, #tpu.memory_space<vmem>>, vector<1x8x1xf32>
      %56 = vector.shape_cast %55 : vector<1x8x1xf32> to vector<8x1xf32>
      %cst_43 = arith.constant dense<0xFF800000> : vector<8xf32>
      %57 = vector.multi_reduction <maximumf>, %54, %cst_43 [1] : vector<8x8xf32> to vector<8xf32>
      %58 = vector.shape_cast %57 : vector<8xf32> to vector<8x1xf32>
      %59 = arith.maximumf %56, %58 : vector<8x1xf32>
      %60 = arith.subf %56, %59 : vector<8x1xf32>
      %61 = math.exp %60 : vector<8x1xf32>
      %62 = vector.broadcast %59 : vector<8x1xf32> to vector<8x8xf32>
      %63 = arith.subf %54, %62 : vector<8x8xf32>
      %64 = math.exp %63 : vector<8x8xf32>
      %c1_44 = arith.constant 1 : index
      %c0_45 = arith.constant 0 : index
      %c0_46 = arith.constant 0 : index
      %65 = vector.load %arg11[%c1_44, %c0_45, %c0_46] : memref<4x8x1xf32, #tpu.memory_space<vmem>>, vector<1x8x1xf32>
      %66 = vector.shape_cast %65 : vector<1x8x1xf32> to vector<8x1xf32>
      %67 = arith.mulf %61, %66 : vector<8x1xf32>
      %cst_47 = arith.constant dense<0.000000e+00> : vector<8xf32>
      %68 = vector.multi_reduction <add>, %64, %cst_47 [1] : vector<8x8xf32> to vector<8xf32>
      %69 = vector.shape_cast %68 : vector<8xf32> to vector<8x1xf32>
      %70 = arith.addf %67, %69 : vector<8x1xf32>
      %c1_48 = arith.constant 1 : index
      %c0_49 = arith.constant 0 : index
      %c0_50 = arith.constant 0 : index
      %71 = vector.load %arg11[%c1_48, %c0_49, %c0_50] : memref<4x8x1xf32, #tpu.memory_space<vmem>>, vector<1x8x1xf32>
      %72 = vector.shape_cast %71 : vector<1x8x1xf32> to vector<8x1xf32>
      %73 = vector.shape_cast %70 : vector<8x1xf32> to vector<1x8x1xf32>
      tpu.vector_store %arg11[%c1_48, %c0_49, %c0_50], %73 {strides = array<i32>} : memref<4x8x1xf32, #tpu.memory_space<vmem>>, vector<1x8x1xf32>,
      %c0_51 = arith.constant 0 : index
      %c8_52 = arith.constant 8 : index
      %74 = vector.load %arg12[%c0_51, %c8_52] : memref<8x32xf32, #tpu.memory_space<vmem>>, vector<8x8xf32>
      %75 = vector.broadcast %61 : vector<8x1xf32> to vector<8x8xf32>
      %76 = arith.mulf %75, %74 : vector<8x8xf32>
      %77 = arith.truncf %64 : vector<8x8xf32> to vector<8x8xbf16>
      %cst_53 = arith.constant dense<0.000000e+00> : vector<8x8xf32>
      %78 = tpu.matmul %77, %53, %cst_53 {dimension_numbers = #tpu.dot_dimension_numbers<[1], [0], [0], [1], [0, 0, 1, 1], [], []>} : vector<8x8xbf16>, vector<8x8xbf16>, vector<8x8xf32> -> vector<8x8xf32>
      %79 = arith.addf %76, %78 : vector<8x8xf32>
      %c0_54 = arith.constant 0 : index
      %c8_55 = arith.constant 8 : index
      %80 = vector.load %arg12[%c0_54, %c8_55] : memref<8x32xf32, #tpu.memory_space<vmem>>, vector<8x8xf32>
      tpu.vector_store %arg12[%c0_54, %c8_55], %79 {strides = array<i32>} : memref<8x32xf32, #tpu.memory_space<vmem>>, vector<8x8xf32>,
      %c1_56 = arith.constant 1 : index
      %c0_57 = arith.constant 0 : index
      %c0_58 = arith.constant 0 : index
      %81 = vector.load %arg10[%c1_56, %c0_57, %c0_58] : memref<4x8x1xf32, #tpu.memory_space<vmem>>, vector<1x8x1xf32>
      %82 = vector.shape_cast %81 : vector<1x8x1xf32> to vector<8x1xf32>
      %83 = vector.shape_cast %59 : vector<8x1xf32> to vector<1x8x1xf32>
      tpu.vector_store %arg10[%c1_56, %c0_57, %c0_58], %83 {strides = array<i32>} : memref<4x8x1xf32, #tpu.memory_space<vmem>>, vector<1x8x1xf32>,
      %c0_59 = arith.constant 0 : index
      %c0_60 = arith.constant 0 : index
      %c16 = arith.constant 16 : index
      %84 = vector.load %arg3[%c0_59, %c0_60, %c16] : memref<1x8x32xbf16, #tpu.memory_space<vmem>>, vector<1x8x8xbf16>
      %85 = vector.shape_cast %84 : vector<1x8x8xbf16> to vector<8x8xbf16>
      %c0_61 = arith.constant 0 : index
      %c0_62 = arith.constant 0 : index
      %c16_63 = arith.constant 16 : index
      %86 = vector.load %arg4[%c0_61, %c0_62, %c16_63] : memref<1x8x32xbf16, #tpu.memory_space<vmem>>, vector<1x8x8xbf16>
      %87 = vector.shape_cast %86 : vector<1x8x8xbf16> to vector<8x8xbf16>
      %c0_64 = arith.constant 0 : index
      %c0_65 = arith.constant 0 : index
      %c16_66 = arith.constant 16 : index
      %88 = vector.load %arg5[%c0_64, %c0_65, %c16_66] : memref<1x8x32xbf16, #tpu.memory_space<vmem>>, vector<1x8x8xbf16>
      %89 = vector.shape_cast %88 : vector<1x8x8xbf16> to vector<8x8xbf16>
      %cst_67 = arith.constant dense<0.000000e+00> : vector<8x8xf32>
      %90 = tpu.matmul %85, %87, %cst_67 {dimension_numbers = #tpu.dot_dimension_numbers<[1], [1], [0], [0], [0, 0, 1, 0], [], []>} : vector<8x8xbf16>, vector<8x8xbf16>, vector<8x8xf32> -> vector<8x8xf32>
      %c2 = arith.constant 2 : index
      %c0_68 = arith.constant 0 : index
      %c0_69 = arith.constant 0 : index
      %91 = vector.load %arg10[%c2, %c0_68, %c0_69] : memref<4x8x1xf32, #tpu.memory_space<vmem>>, vector<1x8x1xf32>
      %92 = vector.shape_cast %91 : vector<1x8x1xf32> to vector<8x1xf32>
      %cst_70 = arith.constant dense<0xFF800000> : vector<8xf32>
      %93 = vector.multi_reduction <maximumf>, %90, %cst_70 [1] : vector<8x8xf32> to vector<8xf32>
      %94 = vector.shape_cast %93 : vector<8xf32> to vector<8x1xf32>
      %95 = arith.maximumf %92, %94 : vector<8x1xf32>
      %96 = arith.subf %92, %95 : vector<8x1xf32>
      %97 = math.exp %96 : vector<8x1xf32>
      %98 = vector.broadcast %95 : vector<8x1xf32> to vector<8x8xf32>
      %99 = arith.subf %90, %98 : vector<8x8xf32>
      %100 = math.exp %99 : vector<8x8xf32>
      %c2_71 = arith.constant 2 : index
      %c0_72 = arith.constant 0 : index
      %c0_73 = arith.constant 0 : index
      %101 = vector.load %arg11[%c2_71, %c0_72, %c0_73] : memref<4x8x1xf32, #tpu.memory_space<vmem>>, vector<1x8x1xf32>
      %102 = vector.shape_cast %101 : vector<1x8x1xf32> to vector<8x1xf32>
      %103 = arith.mulf %97, %102 : vector<8x1xf32>
      %cst_74 = arith.constant dense<0.000000e+00> : vector<8xf32>
      %104 = vector.multi_reduction <add>, %100, %cst_74 [1] : vector<8x8xf32> to vector<8xf32>
      %105 = vector.shape_cast %104 : vector<8xf32> to vector<8x1xf32>
      %106 = arith.addf %103, %105 : vector<8x1xf32>
      %c2_75 = arith.constant 2 : index
      %c0_76 = arith.constant 0 : index
      %c0_77 = arith.constant 0 : index
      %107 = vector.load %arg11[%c2_75, %c0_76, %c0_77] : memref<4x8x1xf32, #tpu.memory_space<vmem>>, vector<1x8x1xf32>
      %108 = vector.shape_cast %107 : vector<1x8x1xf32> to vector<8x1xf32>
      %109 = vector.shape_cast %106 : vector<8x1xf32> to vector<1x8x1xf32>
      tpu.vector_store %arg11[%c2_75, %c0_76, %c0_77], %109 {strides = array<i32>} : memref<4x8x1xf32, #tpu.memory_space<vmem>>, vector<1x8x1xf32>,
      %c0_78 = arith.constant 0 : index
      %c16_79 = arith.constant 16 : index
      %110 = vector.load %arg12[%c0_78, %c16_79] : memref<8x32xf32, #tpu.memory_space<vmem>>, vector<8x8xf32>
      %111 = vector.broadcast %97 : vector<8x1xf32> to vector<8x8xf32>
      %112 = arith.mulf %111, %110 : vector<8x8xf32>
      %113 = arith.truncf %100 : vector<8x8xf32> to vector<8x8xbf16>
      %cst_80 = arith.constant dense<0.000000e+00> : vector<8x8xf32>
      %114 = tpu.matmul %113, %89, %cst_80 {dimension_numbers = #tpu.dot_dimension_numbers<[1], [0], [0], [1], [0, 0, 1, 1], [], []>} : vector<8x8xbf16>, vector<8x8xbf16>, vector<8x8xf32> -> vector<8x8xf32>
      %115 = arith.addf %112, %114 : vector<8x8xf32>
      %c0_81 = arith.constant 0 : index
      %c16_82 = arith.constant 16 : index
      %116 = vector.load %arg12[%c0_81, %c16_82] : memref<8x32xf32, #tpu.memory_space<vmem>>, vector<8x8xf32>
      tpu.vector_store %arg12[%c0_81, %c16_82], %115 {strides = array<i32>} : memref<8x32xf32, #tpu.memory_space<vmem>>, vector<8x8xf32>,
      %c2_83 = arith.constant 2 : index
      %c0_84 = arith.constant 0 : index
      %c0_85 = arith.constant 0 : index
      %117 = vector.load %arg10[%c2_83, %c0_84, %c0_85] : memref<4x8x1xf32, #tpu.memory_space<vmem>>, vector<1x8x1xf32>
      %118 = vector.shape_cast %117 : vector<1x8x1xf32> to vector<8x1xf32>
      %119 = vector.shape_cast %95 : vector<8x1xf32> to vector<1x8x1xf32>
      tpu.vector_store %arg10[%c2_83, %c0_84, %c0_85], %119 {strides = array<i32>} : memref<4x8x1xf32, #tpu.memory_space<vmem>>, vector<1x8x1xf32>,
      %c0_86 = arith.constant 0 : index
      %c0_87 = arith.constant 0 : index
      %c24 = arith.constant 24 : index
      %120 = vector.load %arg3[%c0_86, %c0_87, %c24] : memref<1x8x32xbf16, #tpu.memory_space<vmem>>, vector<1x8x8xbf16>
      %121 = vector.shape_cast %120 : vector<1x8x8xbf16> to vector<8x8xbf16>
      %c0_88 = arith.constant 0 : index
      %c0_89 = arith.constant 0 : index
      %c24_90 = arith.constant 24 : index
      %122 = vector.load %arg4[%c0_88, %c0_89, %c24_90] : memref<1x8x32xbf16, #tpu.memory_space<vmem>>, vector<1x8x8xbf16>
      %123 = vector.shape_cast %122 : vector<1x8x8xbf16> to vector<8x8xbf16>
      %c0_91 = arith.constant 0 : index
      %c0_92 = arith.constant 0 : index
      %c24_93 = arith.constant 24 : index
      %124 = vector.load %arg5[%c0_91, %c0_92, %c24_93] : memref<1x8x32xbf16, #tpu.memory_space<vmem>>, vector<1x8x8xbf16>
      %125 = vector.shape_cast %124 : vector<1x8x8xbf16> to vector<8x8xbf16>
      %cst_94 = arith.constant dense<0.000000e+00> : vector<8x8xf32>
      %126 = tpu.matmul %121, %123, %cst_94 {dimension_numbers = #tpu.dot_dimension_numbers<[1], [1], [0], [0], [0, 0, 1, 0], [], []>} : vector<8x8xbf16>, vector<8x8xbf16>, vector<8x8xf32> -> vector<8x8xf32>
      %c3 = arith.constant 3 : index
      %c0_95 = arith.constant 0 : index
      %c0_96 = arith.constant 0 : index
      %127 = vector.load %arg10[%c3, %c0_95, %c0_96] : memref<4x8x1xf32, #tpu.memory_space<vmem>>, vector<1x8x1xf32>
      %128 = vector.shape_cast %127 : vector<1x8x1xf32> to vector<8x1xf32>
      %cst_97 = arith.constant dense<0xFF800000> : vector<8xf32>
      %129 = vector.multi_reduction <maximumf>, %126, %cst_97 [1] : vector<8x8xf32> to vector<8xf32>
      %130 = vector.shape_cast %129 : vector<8xf32> to vector<8x1xf32>
      %131 = arith.maximumf %128, %130 : vector<8x1xf32>
      %132 = arith.subf %128, %131 : vector<8x1xf32>
      %133 = math.exp %132 : vector<8x1xf32>
      %134 = vector.broadcast %131 : vector<8x1xf32> to vector<8x8xf32>
      %135 = arith.subf %126, %134 : vector<8x8xf32>
      %136 = math.exp %135 : vector<8x8xf32>
      %c3_98 = arith.constant 3 : index
      %c0_99 = arith.constant 0 : index
      %c0_100 = arith.constant 0 : index
      %137 = vector.load %arg11[%c3_98, %c0_99, %c0_100] : memref<4x8x1xf32, #tpu.memory_space<vmem>>, vector<1x8x1xf32>
      %138 = vector.shape_cast %137 : vector<1x8x1xf32> to vector<8x1xf32>
      %139 = arith.mulf %133, %138 : vector<8x1xf32>
      %cst_101 = arith.constant dense<0.000000e+00> : vector<8xf32>
      %140 = vector.multi_reduction <add>, %136, %cst_101 [1] : vector<8x8xf32> to vector<8xf32>
      %141 = vector.shape_cast %140 : vector<8xf32> to vector<8x1xf32>
      %142 = arith.addf %139, %141 : vector<8x1xf32>
      %c3_102 = arith.constant 3 : index
      %c0_103 = arith.constant 0 : index
      %c0_104 = arith.constant 0 : index
      %143 = vector.load %arg11[%c3_102, %c0_103, %c0_104] : memref<4x8x1xf32, #tpu.memory_space<vmem>>, vector<1x8x1xf32>
      %144 = vector.shape_cast %143 : vector<1x8x1xf32> to vector<8x1xf32>
      %145 = vector.shape_cast %142 : vector<8x1xf32> to vector<1x8x1xf32>
      tpu.vector_store %arg11[%c3_102, %c0_103, %c0_104], %145 {strides = array<i32>} : memref<4x8x1xf32, #tpu.memory_space<vmem>>, vector<1x8x1xf32>,
      %c0_105 = arith.constant 0 : index
      %c24_106 = arith.constant 24 : index
      %146 = vector.load %arg12[%c0_105, %c24_106] : memref<8x32xf32, #tpu.memory_space<vmem>>, vector<8x8xf32>
      %147 = vector.broadcast %133 : vector<8x1xf32> to vector<8x8xf32>
      %148 = arith.mulf %147, %146 : vector<8x8xf32>
      %149 = arith.truncf %136 : vector<8x8xf32> to vector<8x8xbf16>
      %cst_107 = arith.constant dense<0.000000e+00> : vector<8x8xf32>
      %150 = tpu.matmul %149, %125, %cst_107 {dimension_numbers = #tpu.dot_dimension_numbers<[1], [0], [0], [1], [0, 0, 1, 1], [], []>} : vector<8x8xbf16>, vector<8x8xbf16>, vector<8x8xf32> -> vector<8x8xf32>
      %151 = arith.addf %148, %150 : vector<8x8xf32>
      %c0_108 = arith.constant 0 : index
      %c24_109 = arith.constant 24 : index
      %152 = vector.load %arg12[%c0_108, %c24_109] : memref<8x32xf32, #tpu.memory_space<vmem>>, vector<8x8xf32>
      tpu.vector_store %arg12[%c0_108, %c24_109], %151 {strides = array<i32>} : memref<8x32xf32, #tpu.memory_space<vmem>>, vector<8x8xf32>,
      %c3_110 = arith.constant 3 : index
      %c0_111 = arith.constant 0 : index
      %c0_112 = arith.constant 0 : index
      %153 = vector.load %arg10[%c3_110, %c0_111, %c0_112] : memref<4x8x1xf32, #tpu.memory_space<vmem>>, vector<1x8x1xf32>
      %154 = vector.shape_cast %153 : vector<1x8x1xf32> to vector<8x1xf32>
      %155 = vector.shape_cast %131 : vector<8x1xf32> to vector<1x8x1xf32>
      tpu.vector_store %arg10[%c3_110, %c0_111, %c0_112], %155 {strides = array<i32>} : memref<4x8x1xf32, #tpu.memory_space<vmem>>, vector<1x8x1xf32>,
    } else {
    }
    %6 = arith.cmpi eq, %arg2, %arg1 : i32
    %7 = arith.extui %6 : i1 to i32
    %c0_i32_2 = arith.constant 0 : i32
    %8 = arith.cmpi ne, %7, %c0_i32_2 : i32
    scf.if %8 {
      %12 = tpu.iota {dimensions = array<i32: 1>} : vector<8x8xi32>
      %13 = tpu.iota {dimensions = array<i32: 0>} : vector<8x8xi32>
      %14 = arith.cmpi sle, %12, %13 : vector<8x8xi32>
      %c0 = arith.constant 0 : index
      %c0_5 = arith.constant 0 : index
      %c0_6 = arith.constant 0 : index
      %15 = vector.load %arg3[%c0, %c0_5, %c0_6] : memref<1x8x32xbf16, #tpu.memory_space<vmem>>, vector<1x8x8xbf16>
      %16 = vector.shape_cast %15 : vector<1x8x8xbf16> to vector<8x8xbf16>
      %c0_7 = arith.constant 0 : index
      %c0_8 = arith.constant 0 : index
      %c0_9 = arith.constant 0 : index
      %17 = vector.load %arg4[%c0_7, %c0_8, %c0_9] : memref<1x8x32xbf16, #tpu.memory_space<vmem>>, vector<1x8x8xbf16>
      %18 = vector.shape_cast %17 : vector<1x8x8xbf16> to vector<8x8xbf16>
      %c0_10 = arith.constant 0 : index
      %c0_11 = arith.constant 0 : index
      %c0_12 = arith.constant 0 : index
      %19 = vector.load %arg5[%c0_10, %c0_11, %c0_12] : memref<1x8x32xbf16, #tpu.memory_space<vmem>>, vector<1x8x8xbf16>
      %20 = vector.shape_cast %19 : vector<1x8x8xbf16> to vector<8x8xbf16>
      %cst = arith.constant dense<0.000000e+00> : vector<8x8xf32>
      %21 = tpu.matmul %16, %18, %cst {dimension_numbers = #tpu.dot_dimension_numbers<[1], [1], [0], [0], [0, 0, 1, 0], [], []>} : vector<8x8xbf16>, vector<8x8xbf16>, vector<8x8xf32> -> vector<8x8xf32>
      %cst_13 = arith.constant -1.000000e+30 : f32
      %22 = vector.broadcast %cst_13 : f32 to vector<8x8xf32>
      %23 = arith.select %14, %21, %22 : vector<8x8xi1>, vector<8x8xf32>
      %c0_14 = arith.constant 0 : index
      %c0_15 = arith.constant 0 : index
      %c0_16 = arith.constant 0 : index
      %24 = vector.load %arg10[%c0_14, %c0_15, %c0_16] : memref<4x8x1xf32, #tpu.memory_space<vmem>>, vector<1x8x1xf32>
      %25 = vector.shape_cast %24 : vector<1x8x1xf32> to vector<8x1xf32>
      %cst_17 = arith.constant dense<0xFF800000> : vector<8xf32>
      %26 = vector.multi_reduction <maximumf>, %23, %cst_17 [1] : vector<8x8xf32> to vector<8xf32>
      %27 = vector.shape_cast %26 : vector<8xf32> to vector<8x1xf32>
      %28 = arith.maximumf %25, %27 : vector<8x1xf32>
      %29 = arith.subf %25, %28 : vector<8x1xf32>
      %30 = math.exp %29 : vector<8x1xf32>
      %31 = vector.broadcast %28 : vector<8x1xf32> to vector<8x8xf32>
      %32 = arith.subf %23, %31 : vector<8x8xf32>
      %33 = math.exp %32 : vector<8x8xf32>
      %c0_18 = arith.constant 0 : index
      %c0_19 = arith.constant 0 : index
      %c0_20 = arith.constant 0 : index
      %34 = vector.load %arg11[%c0_18, %c0_19, %c0_20] : memref<4x8x1xf32, #tpu.memory_space<vmem>>, vector<1x8x1xf32>
      %35 = vector.shape_cast %34 : vector<1x8x1xf32> to vector<8x1xf32>
      %36 = arith.mulf %30, %35 : vector<8x1xf32>
      %cst_21 = arith.constant dense<0.000000e+00> : vector<8xf32>
      %37 = vector.multi_reduction <add>, %33, %cst_21 [1] : vector<8x8xf32> to vector<8xf32>
      %38 = vector.shape_cast %37 : vector<8xf32> to vector<8x1xf32>
      %39 = arith.addf %36, %38 : vector<8x1xf32>
      %c0_22 = arith.constant 0 : index
      %c0_23 = arith.constant 0 : index
      %c0_24 = arith.constant 0 : index
      %40 = vector.load %arg11[%c0_22, %c0_23, %c0_24] : memref<4x8x1xf32, #tpu.memory_space<vmem>>, vector<1x8x1xf32>
      %41 = vector.shape_cast %40 : vector<1x8x1xf32> to vector<8x1xf32>
      %42 = vector.shape_cast %39 : vector<8x1xf32> to vector<1x8x1xf32>
      tpu.vector_store %arg11[%c0_22, %c0_23, %c0_24], %42 {strides = array<i32>} : memref<4x8x1xf32, #tpu.memory_space<vmem>>, vector<1x8x1xf32>,
      %c0_25 = arith.constant 0 : index
      %c0_26 = arith.constant 0 : index
      %43 = vector.load %arg12[%c0_25, %c0_26] : memref<8x32xf32, #tpu.memory_space<vmem>>, vector<8x8xf32>
      %44 = vector.broadcast %30 : vector<8x1xf32> to vector<8x8xf32>
      %45 = arith.mulf %44, %43 : vector<8x8xf32>
      %46 = arith.truncf %33 : vector<8x8xf32> to vector<8x8xbf16>
      %cst_27 = arith.constant dense<0.000000e+00> : vector<8x8xf32>
      %47 = tpu.matmul %46, %20, %cst_27 {dimension_numbers = #tpu.dot_dimension_numbers<[1], [0], [0], [1], [0, 0, 1, 1], [], []>} : vector<8x8xbf16>, vector<8x8xbf16>, vector<8x8xf32> -> vector<8x8xf32>
      %48 = arith.addf %45, %47 : vector<8x8xf32>
      %c0_28 = arith.constant 0 : index
      %c0_29 = arith.constant 0 : index
      %49 = vector.load %arg12[%c0_28, %c0_29] : memref<8x32xf32, #tpu.memory_space<vmem>>, vector<8x8xf32>
      tpu.vector_store %arg12[%c0_28, %c0_29], %48 {strides = array<i32>} : memref<8x32xf32, #tpu.memory_space<vmem>>, vector<8x8xf32>,
      %c0_30 = arith.constant 0 : index
      %c0_31 = arith.constant 0 : index
      %c0_32 = arith.constant 0 : index
      %50 = vector.load %arg10[%c0_30, %c0_31, %c0_32] : memref<4x8x1xf32, #tpu.memory_space<vmem>>, vector<1x8x1xf32>
      %51 = vector.shape_cast %50 : vector<1x8x1xf32> to vector<8x1xf32>
      %52 = vector.shape_cast %28 : vector<8x1xf32> to vector<1x8x1xf32>
      tpu.vector_store %arg10[%c0_30, %c0_31, %c0_32], %52 {strides = array<i32>} : memref<4x8x1xf32, #tpu.memory_space<vmem>>, vector<1x8x1xf32>,
      %c0_33 = arith.constant 0 : index
      %c0_34 = arith.constant 0 : index
      %c8 = arith.constant 8 : index
      %53 = vector.load %arg3[%c0_33, %c0_34, %c8] : memref<1x8x32xbf16, #tpu.memory_space<vmem>>, vector<1x8x8xbf16>
      %54 = vector.shape_cast %53 : vector<1x8x8xbf16> to vector<8x8xbf16>
      %c0_35 = arith.constant 0 : index
      %c0_36 = arith.constant 0 : index
      %c8_37 = arith.constant 8 : index
      %55 = vector.load %arg4[%c0_35, %c0_36, %c8_37] : memref<1x8x32xbf16, #tpu.memory_space<vmem>>, vector<1x8x8xbf16>
      %56 = vector.shape_cast %55 : vector<1x8x8xbf16> to vector<8x8xbf16>
      %c0_38 = arith.constant 0 : index
      %c0_39 = arith.constant 0 : index
      %c8_40 = arith.constant 8 : index
      %57 = vector.load %arg5[%c0_38, %c0_39, %c8_40] : memref<1x8x32xbf16, #tpu.memory_space<vmem>>, vector<1x8x8xbf16>
      %58 = vector.shape_cast %57 : vector<1x8x8xbf16> to vector<8x8xbf16>
      %cst_41 = arith.constant dense<0.000000e+00> : vector<8x8xf32>
      %59 = tpu.matmul %54, %56, %cst_41 {dimension_numbers = #tpu.dot_dimension_numbers<[1], [1], [0], [0], [0, 0, 1, 0], [], []>} : vector<8x8xbf16>, vector<8x8xbf16>, vector<8x8xf32> -> vector<8x8xf32>
      %cst_42 = arith.constant -1.000000e+30 : f32
      %60 = vector.broadcast %cst_42 : f32 to vector<8x8xf32>
      %61 = arith.select %14, %59, %60 : vector<8x8xi1>, vector<8x8xf32>
      %c1 = arith.constant 1 : index
      %c0_43 = arith.constant 0 : index
      %c0_44 = arith.constant 0 : index
      %62 = vector.load %arg10[%c1, %c0_43, %c0_44] : memref<4x8x1xf32, #tpu.memory_space<vmem>>, vector<1x8x1xf32>
      %63 = vector.shape_cast %62 : vector<1x8x1xf32> to vector<8x1xf32>
      %cst_45 = arith.constant dense<0xFF800000> : vector<8xf32>
      %64 = vector.multi_reduction <maximumf>, %61, %cst_45 [1] : vector<8x8xf32> to vector<8xf32>
      %65 = vector.shape_cast %64 : vector<8xf32> to vector<8x1xf32>
      %66 = arith.maximumf %63, %65 : vector<8x1xf32>
      %67 = arith.subf %63, %66 : vector<8x1xf32>
      %68 = math.exp %67 : vector<8x1xf32>
      %69 = vector.broadcast %66 : vector<8x1xf32> to vector<8x8xf32>
      %70 = arith.subf %61, %69 : vector<8x8xf32>
      %71 = math.exp %70 : vector<8x8xf32>
      %c1_46 = arith.constant 1 : index
      %c0_47 = arith.constant 0 : index
      %c0_48 = arith.constant 0 : index
      %72 = vector.load %arg11[%c1_46, %c0_47, %c0_48] : memref<4x8x1xf32, #tpu.memory_space<vmem>>, vector<1x8x1xf32>
      %73 = vector.shape_cast %72 : vector<1x8x1xf32> to vector<8x1xf32>
      %74 = arith.mulf %68, %73 : vector<8x1xf32>
      %cst_49 = arith.constant dense<0.000000e+00> : vector<8xf32>
      %75 = vector.multi_reduction <add>, %71, %cst_49 [1] : vector<8x8xf32> to vector<8xf32>
      %76 = vector.shape_cast %75 : vector<8xf32> to vector<8x1xf32>
      %77 = arith.addf %74, %76 : vector<8x1xf32>
      %c1_50 = arith.constant 1 : index
      %c0_51 = arith.constant 0 : index
      %c0_52 = arith.constant 0 : index
      %78 = vector.load %arg11[%c1_50, %c0_51, %c0_52] : memref<4x8x1xf32, #tpu.memory_space<vmem>>, vector<1x8x1xf32>
      %79 = vector.shape_cast %78 : vector<1x8x1xf32> to vector<8x1xf32>
      %80 = vector.shape_cast %77 : vector<8x1xf32> to vector<1x8x1xf32>
      tpu.vector_store %arg11[%c1_50, %c0_51, %c0_52], %80 {strides = array<i32>} : memref<4x8x1xf32, #tpu.memory_space<vmem>>, vector<1x8x1xf32>,
      %c0_53 = arith.constant 0 : index
      %c8_54 = arith.constant 8 : index
      %81 = vector.load %arg12[%c0_53, %c8_54] : memref<8x32xf32, #tpu.memory_space<vmem>>, vector<8x8xf32>
      %82 = vector.broadcast %68 : vector<8x1xf32> to vector<8x8xf32>
      %83 = arith.mulf %82, %81 : vector<8x8xf32>
      %84 = arith.truncf %71 : vector<8x8xf32> to vector<8x8xbf16>
      %cst_55 = arith.constant dense<0.000000e+00> : vector<8x8xf32>
      %85 = tpu.matmul %84, %58, %cst_55 {dimension_numbers = #tpu.dot_dimension_numbers<[1], [0], [0], [1], [0, 0, 1, 1], [], []>} : vector<8x8xbf16>, vector<8x8xbf16>, vector<8x8xf32> -> vector<8x8xf32>
      %86 = arith.addf %83, %85 : vector<8x8xf32>
      %c0_56 = arith.constant 0 : index
      %c8_57 = arith.constant 8 : index
      %87 = vector.load %arg12[%c0_56, %c8_57] : memref<8x32xf32, #tpu.memory_space<vmem>>, vector<8x8xf32>
      tpu.vector_store %arg12[%c0_56, %c8_57], %86 {strides = array<i32>} : memref<8x32xf32, #tpu.memory_space<vmem>>, vector<8x8xf32>,
      %c1_58 = arith.constant 1 : index
      %c0_59 = arith.constant 0 : index
      %c0_60 = arith.constant 0 : index
      %88 = vector.load %arg10[%c1_58, %c0_59, %c0_60] : memref<4x8x1xf32, #tpu.memory_space<vmem>>, vector<1x8x1xf32>
      %89 = vector.shape_cast %88 : vector<1x8x1xf32> to vector<8x1xf32>
      %90 = vector.shape_cast %66 : vector<8x1xf32> to vector<1x8x1xf32>
      tpu.vector_store %arg10[%c1_58, %c0_59, %c0_60], %90 {strides = array<i32>} : memref<4x8x1xf32, #tpu.memory_space<vmem>>, vector<1x8x1xf32>,
      %c0_61 = arith.constant 0 : index
      %c0_62 = arith.constant 0 : index
      %c16 = arith.constant 16 : index
      %91 = vector.load %arg3[%c0_61, %c0_62, %c16] : memref<1x8x32xbf16, #tpu.memory_space<vmem>>, vector<1x8x8xbf16>
      %92 = vector.shape_cast %91 : vector<1x8x8xbf16> to vector<8x8xbf16>
      %c0_63 = arith.constant 0 : index
      %c0_64 = arith.constant 0 : index
      %c16_65 = arith.constant 16 : index
      %93 = vector.load %arg4[%c0_63, %c0_64, %c16_65] : memref<1x8x32xbf16, #tpu.memory_space<vmem>>, vector<1x8x8xbf16>
      %94 = vector.shape_cast %93 : vector<1x8x8xbf16> to vector<8x8xbf16>
      %c0_66 = arith.constant 0 : index
      %c0_67 = arith.constant 0 : index
      %c16_68 = arith.constant 16 : index
      %95 = vector.load %arg5[%c0_66, %c0_67, %c16_68] : memref<1x8x32xbf16, #tpu.memory_space<vmem>>, vector<1x8x8xbf16>
      %96 = vector.shape_cast %95 : vector<1x8x8xbf16> to vector<8x8xbf16>
      %cst_69 = arith.constant dense<0.000000e+00> : vector<8x8xf32>
      %97 = tpu.matmul %92, %94, %cst_69 {dimension_numbers = #tpu.dot_dimension_numbers<[1], [1], [0], [0], [0, 0, 1, 0], [], []>} : vector<8x8xbf16>, vector<8x8xbf16>, vector<8x8xf32> -> vector<8x8xf32>
      %cst_70 = arith.constant -1.000000e+30 : f32
      %98 = vector.broadcast %cst_70 : f32 to vector<8x8xf32>
      %99 = arith.select %14, %97, %98 : vector<8x8xi1>, vector<8x8xf32>
      %c2 = arith.constant 2 : index
      %c0_71 = arith.constant 0 : index
      %c0_72 = arith.constant 0 : index
      %100 = vector.load %arg10[%c2, %c0_71, %c0_72] : memref<4x8x1xf32, #tpu.memory_space<vmem>>, vector<1x8x1xf32>
      %101 = vector.shape_cast %100 : vector<1x8x1xf32> to vector<8x1xf32>
      %cst_73 = arith.constant dense<0xFF800000> : vector<8xf32>
      %102 = vector.multi_reduction <maximumf>, %99, %cst_73 [1] : vector<8x8xf32> to vector<8xf32>
      %103 = vector.shape_cast %102 : vector<8xf32> to vector<8x1xf32>
      %104 = arith.maximumf %101, %103 : vector<8x1xf32>
      %105 = arith.subf %101, %104 : vector<8x1xf32>
      %106 = math.exp %105 : vector<8x1xf32>
      %107 = vector.broadcast %104 : vector<8x1xf32> to vector<8x8xf32>
      %108 = arith.subf %99, %107 : vector<8x8xf32>
      %109 = math.exp %108 : vector<8x8xf32>
      %c2_74 = arith.constant 2 : index
      %c0_75 = arith.constant 0 : index
      %c0_76 = arith.constant 0 : index
      %110 = vector.load %arg11[%c2_74, %c0_75, %c0_76] : memref<4x8x1xf32, #tpu.memory_space<vmem>>, vector<1x8x1xf32>
      %111 = vector.shape_cast %110 : vector<1x8x1xf32> to vector<8x1xf32>
      %112 = arith.mulf %106, %111 : vector<8x1xf32>
      %cst_77 = arith.constant dense<0.000000e+00> : vector<8xf32>
      %113 = vector.multi_reduction <add>, %109, %cst_77 [1] : vector<8x8xf32> to vector<8xf32>
      %114 = vector.shape_cast %113 : vector<8xf32> to vector<8x1xf32>
      %115 = arith.addf %112, %114 : vector<8x1xf32>
      %c2_78 = arith.constant 2 : index
      %c0_79 = arith.constant 0 : index
      %c0_80 = arith.constant 0 : index
      %116 = vector.load %arg11[%c2_78, %c0_79, %c0_80] : memref<4x8x1xf32, #tpu.memory_space<vmem>>, vector<1x8x1xf32>
      %117 = vector.shape_cast %116 : vector<1x8x1xf32> to vector<8x1xf32>
      %118 = vector.shape_cast %115 : vector<8x1xf32> to vector<1x8x1xf32>
      tpu.vector_store %arg11[%c2_78, %c0_79, %c0_80], %118 {strides = array<i32>} : memref<4x8x1xf32, #tpu.memory_space<vmem>>, vector<1x8x1xf32>,
      %c0_81 = arith.constant 0 : index
      %c16_82 = arith.constant 16 : index
      %119 = vector.load %arg12[%c0_81, %c16_82] : memref<8x32xf32, #tpu.memory_space<vmem>>, vector<8x8xf32>
      %120 = vector.broadcast %106 : vector<8x1xf32> to vector<8x8xf32>
      %121 = arith.mulf %120, %119 : vector<8x8xf32>
      %122 = arith.truncf %109 : vector<8x8xf32> to vector<8x8xbf16>
      %cst_83 = arith.constant dense<0.000000e+00> : vector<8x8xf32>
      %123 = tpu.matmul %122, %96, %cst_83 {dimension_numbers = #tpu.dot_dimension_numbers<[1], [0], [0], [1], [0, 0, 1, 1], [], []>} : vector<8x8xbf16>, vector<8x8xbf16>, vector<8x8xf32> -> vector<8x8xf32>
      %124 = arith.addf %121, %123 : vector<8x8xf32>
      %c0_84 = arith.constant 0 : index
      %c16_85 = arith.constant 16 : index
      %125 = vector.load %arg12[%c0_84, %c16_85] : memref<8x32xf32, #tpu.memory_space<vmem>>, vector<8x8xf32>
      tpu.vector_store %arg12[%c0_84, %c16_85], %124 {strides = array<i32>} : memref<8x32xf32, #tpu.memory_space<vmem>>, vector<8x8xf32>,
      %c2_86 = arith.constant 2 : index
      %c0_87 = arith.constant 0 : index
      %c0_88 = arith.constant 0 : index
      %126 = vector.load %arg10[%c2_86, %c0_87, %c0_88] : memref<4x8x1xf32, #tpu.memory_space<vmem>>, vector<1x8x1xf32>
      %127 = vector.shape_cast %126 : vector<1x8x1xf32> to vector<8x1xf32>
      %128 = vector.shape_cast %104 : vector<8x1xf32> to vector<1x8x1xf32>
      tpu.vector_store %arg10[%c2_86, %c0_87, %c0_88], %128 {strides = array<i32>} : memref<4x8x1xf32, #tpu.memory_space<vmem>>, vector<1x8x1xf32>,
      %c0_89 = arith.constant 0 : index
      %c0_90 = arith.constant 0 : index
      %c24 = arith.constant 24 : index
      %129 = vector.load %arg3[%c0_89, %c0_90, %c24] : memref<1x8x32xbf16, #tpu.memory_space<vmem>>, vector<1x8x8xbf16>
      %130 = vector.shape_cast %129 : vector<1x8x8xbf16> to vector<8x8xbf16>
      %c0_91 = arith.constant 0 : index
      %c0_92 = arith.constant 0 : index
      %c24_93 = arith.constant 24 : index
      %131 = vector.load %arg4[%c0_91, %c0_92, %c24_93] : memref<1x8x32xbf16, #tpu.memory_space<vmem>>, vector<1x8x8xbf16>
      %132 = vector.shape_cast %131 : vector<1x8x8xbf16> to vector<8x8xbf16>
      %c0_94 = arith.constant 0 : index
      %c0_95 = arith.constant 0 : index
      %c24_96 = arith.constant 24 : index
      %133 = vector.load %arg5[%c0_94, %c0_95, %c24_96] : memref<1x8x32xbf16, #tpu.memory_space<vmem>>, vector<1x8x8xbf16>
      %134 = vector.shape_cast %133 : vector<1x8x8xbf16> to vector<8x8xbf16>
      %cst_97 = arith.constant dense<0.000000e+00> : vector<8x8xf32>
      %135 = tpu.matmul %130, %132, %cst_97 {dimension_numbers = #tpu.dot_dimension_numbers<[1], [1], [0], [0], [0, 0, 1, 0], [], []>} : vector<8x8xbf16>, vector<8x8xbf16>, vector<8x8xf32> -> vector<8x8xf32>
      %cst_98 = arith.constant -1.000000e+30 : f32
      %136 = vector.broadcast %cst_98 : f32 to vector<8x8xf32>
      %137 = arith.select %14, %135, %136 : vector<8x8xi1>, vector<8x8xf32>
      %c3 = arith.constant 3 : index
      %c0_99 = arith.constant 0 : index
      %c0_100 = arith.constant 0 : index
      %138 = vector.load %arg10[%c3, %c0_99, %c0_100] : memref<4x8x1xf32, #tpu.memory_space<vmem>>, vector<1x8x1xf32>
      %139 = vector.shape_cast %138 : vector<1x8x1xf32> to vector<8x1xf32>
      %cst_101 = arith.constant dense<0xFF800000> : vector<8xf32>
      %140 = vector.multi_reduction <maximumf>, %137, %cst_101 [1] : vector<8x8xf32> to vector<8xf32>
      %141 = vector.shape_cast %140 : vector<8xf32> to vector<8x1xf32>
      %142 = arith.maximumf %139, %141 : vector<8x1xf32>
      %143 = arith.subf %139, %142 : vector<8x1xf32>
      %144 = math.exp %143 : vector<8x1xf32>
      %145 = vector.broadcast %142 : vector<8x1xf32> to vector<8x8xf32>
      %146 = arith.subf %137, %145 : vector<8x8xf32>
      %147 = math.exp %146 : vector<8x8xf32>
      %c3_102 = arith.constant 3 : index
      %c0_103 = arith.constant 0 : index
      %c0_104 = arith.constant 0 : index
      %148 = vector.load %arg11[%c3_102, %c0_103, %c0_104] : memref<4x8x1xf32, #tpu.memory_space<vmem>>, vector<1x8x1xf32>
      %149 = vector.shape_cast %148 : vector<1x8x1xf32> to vector<8x1xf32>
      %150 = arith.mulf %144, %149 : vector<8x1xf32>
      %cst_105 = arith.constant dense<0.000000e+00> : vector<8xf32>
      %151 = vector.multi_reduction <add>, %147, %cst_105 [1] : vector<8x8xf32> to vector<8xf32>
      %152 = vector.shape_cast %151 : vector<8xf32> to vector<8x1xf32>
      %153 = arith.addf %150, %152 : vector<8x1xf32>
      %c3_106 = arith.constant 3 : index
      %c0_107 = arith.constant 0 : index
      %c0_108 = arith.constant 0 : index
      %154 = vector.load %arg11[%c3_106, %c0_107, %c0_108] : memref<4x8x1xf32, #tpu.memory_space<vmem>>, vector<1x8x1xf32>
      %155 = vector.shape_cast %154 : vector<1x8x1xf32> to vector<8x1xf32>
      %156 = vector.shape_cast %153 : vector<8x1xf32> to vector<1x8x1xf32>
      tpu.vector_store %arg11[%c3_106, %c0_107, %c0_108], %156 {strides = array<i32>} : memref<4x8x1xf32, #tpu.memory_space<vmem>>, vector<1x8x1xf32>,
      %c0_109 = arith.constant 0 : index
      %c24_110 = arith.constant 24 : index
      %157 = vector.load %arg12[%c0_109, %c24_110] : memref<8x32xf32, #tpu.memory_space<vmem>>, vector<8x8xf32>
      %158 = vector.broadcast %144 : vector<8x1xf32> to vector<8x8xf32>
      %159 = arith.mulf %158, %157 : vector<8x8xf32>
      %160 = arith.truncf %147 : vector<8x8xf32> to vector<8x8xbf16>
      %cst_111 = arith.constant dense<0.000000e+00> : vector<8x8xf32>
      %161 = tpu.matmul %160, %134, %cst_111 {dimension_numbers = #tpu.dot_dimension_numbers<[1], [0], [0], [1], [0, 0, 1, 1], [], []>} : vector<8x8xbf16>, vector<8x8xbf16>, vector<8x8xf32> -> vector<8x8xf32>
      %162 = arith.addf %159, %161 : vector<8x8xf32>
      %c0_112 = arith.constant 0 : index
      %c24_113 = arith.constant 24 : index
      %163 = vector.load %arg12[%c0_112, %c24_113] : memref<8x32xf32, #tpu.memory_space<vmem>>, vector<8x8xf32>
      tpu.vector_store %arg12[%c0_112, %c24_113], %162 {strides = array<i32>} : memref<8x32xf32, #tpu.memory_space<vmem>>, vector<8x8xf32>,
      %c3_114 = arith.constant 3 : index
      %c0_115 = arith.constant 0 : index
      %c0_116 = arith.constant 0 : index
      %164 = vector.load %arg10[%c3_114, %c0_115, %c0_116] : memref<4x8x1xf32, #tpu.memory_space<vmem>>, vector<1x8x1xf32>
      %165 = vector.shape_cast %164 : vector<1x8x1xf32> to vector<8x1xf32>
      %166 = vector.shape_cast %142 : vector<8x1xf32> to vector<1x8x1xf32>
      tpu.vector_store %arg10[%c3_114, %c0_115, %c0_116], %166 {strides = array<i32>} : memref<4x8x1xf32, #tpu.memory_space<vmem>>, vector<1x8x1xf32>,
    } else {
    }
    %c0_i32_3 = arith.constant 0 : i32
    %9 = arith.cmpi eq, %arg2, %c0_i32_3 : i32
    %10 = arith.extui %9 : i1 to i32
    %c0_i32_4 = arith.constant 0 : i32
    %11 = arith.cmpi ne, %10, %c0_i32_4 : i32
    scf.if %11 {
      %c0 = arith.constant 0 : index
      %c0_5 = arith.constant 0 : index
      %12 = vector.load %arg12[%c0, %c0_5] : memref<8x32xf32, #tpu.memory_space<vmem>>, vector<8x8xf32>
      %c0_6 = arith.constant 0 : index
      %c0_7 = arith.constant 0 : index
      %c0_8 = arith.constant 0 : index
      %13 = vector.load %arg11[%c0_6, %c0_7, %c0_8] : memref<4x8x1xf32, #tpu.memory_space<vmem>>, vector<1x8x1xf32>
      %14 = vector.shape_cast %13 : vector<1x8x1xf32> to vector<8x1xf32>
      %15 = tpu.reciprocal %14 {approx = true} : vector<8x1xf32> -> vector<8x1xf32>
      %16 = vector.broadcast %15 : vector<8x1xf32> to vector<8x8xf32>
      %17 = arith.mulf %12, %16 : vector<8x8xf32>
      %c0_9 = arith.constant 0 : index
      %c0_10 = arith.constant 0 : index
      %18 = vector.load %arg12[%c0_9, %c0_10] : memref<8x32xf32, #tpu.memory_space<vmem>>, vector<8x8xf32>
      tpu.vector_store %arg12[%c0_9, %c0_10], %17 {strides = array<i32>} : memref<8x32xf32, #tpu.memory_space<vmem>>, vector<8x8xf32>,
      %c0_11 = arith.constant 0 : index
      %c8 = arith.constant 8 : index
      %19 = vector.load %arg12[%c0_11, %c8] : memref<8x32xf32, #tpu.memory_space<vmem>>, vector<8x8xf32>
      %c1 = arith.constant 1 : index
      %c0_12 = arith.constant 0 : index
      %c0_13 = arith.constant 0 : index
      %20 = vector.load %arg11[%c1, %c0_12, %c0_13] : memref<4x8x1xf32, #tpu.memory_space<vmem>>, vector<1x8x1xf32>
      %21 = vector.shape_cast %20 : vector<1x8x1xf32> to vector<8x1xf32>
      %22 = tpu.reciprocal %21 {approx = true} : vector<8x1xf32> -> vector<8x1xf32>
      %23 = vector.broadcast %22 : vector<8x1xf32> to vector<8x8xf32>
      %24 = arith.mulf %19, %23 : vector<8x8xf32>
      %c0_14 = arith.constant 0 : index
      %c8_15 = arith.constant 8 : index
      %25 = vector.load %arg12[%c0_14, %c8_15] : memref<8x32xf32, #tpu.memory_space<vmem>>, vector<8x8xf32>
      tpu.vector_store %arg12[%c0_14, %c8_15], %24 {strides = array<i32>} : memref<8x32xf32, #tpu.memory_space<vmem>>, vector<8x8xf32>,
      %c0_16 = arith.constant 0 : index
      %c16 = arith.constant 16 : index
      %26 = vector.load %arg12[%c0_16, %c16] : memref<8x32xf32, #tpu.memory_space<vmem>>, vector<8x8xf32>
      %c2 = arith.constant 2 : index
      %c0_17 = arith.constant 0 : index
      %c0_18 = arith.constant 0 : index
      %27 = vector.load %arg11[%c2, %c0_17, %c0_18] : memref<4x8x1xf32, #tpu.memory_space<vmem>>, vector<1x8x1xf32>
      %28 = vector.shape_cast %27 : vector<1x8x1xf32> to vector<8x1xf32>
      %29 = tpu.reciprocal %28 {approx = true} : vector<8x1xf32> -> vector<8x1xf32>
      %30 = vector.broadcast %29 : vector<8x1xf32> to vector<8x8xf32>
      %31 = arith.mulf %26, %30 : vector<8x8xf32>
      %c0_19 = arith.constant 0 : index
      %c16_20 = arith.constant 16 : index
      %32 = vector.load %arg12[%c0_19, %c16_20] : memref<8x32xf32, #tpu.memory_space<vmem>>, vector<8x8xf32>
      tpu.vector_store %arg12[%c0_19, %c16_20], %31 {strides = array<i32>} : memref<8x32xf32, #tpu.memory_space<vmem>>, vector<8x8xf32>,
      %c0_21 = arith.constant 0 : index
      %c24 = arith.constant 24 : index
      %33 = vector.load %arg12[%c0_21, %c24] : memref<8x32xf32, #tpu.memory_space<vmem>>, vector<8x8xf32>
      %c3 = arith.constant 3 : index
      %c0_22 = arith.constant 0 : index
      %c0_23 = arith.constant 0 : index
      %34 = vector.load %arg11[%c3, %c0_22, %c0_23] : memref<4x8x1xf32, #tpu.memory_space<vmem>>, vector<1x8x1xf32>
      %35 = vector.shape_cast %34 : vector<1x8x1xf32> to vector<8x1xf32>
      %36 = tpu.reciprocal %35 {approx = true} : vector<8x1xf32> -> vector<8x1xf32>
      %37 = vector.broadcast %36 : vector<8x1xf32> to vector<8x8xf32>
      %38 = arith.mulf %33, %37 : vector<8x8xf32>
      %c0_24 = arith.constant 0 : index
      %c24_25 = arith.constant 24 : index
      %39 = vector.load %arg12[%c0_24, %c24_25] : memref<8x32xf32, #tpu.memory_space<vmem>>, vector<8x8xf32>
      tpu.vector_store %arg12[%c0_24, %c24_25], %38 {strides = array<i32>} : memref<8x32xf32, #tpu.memory_space<vmem>>, vector<8x8xf32>,
      %c0_26 = arith.constant 0 : index
      %c0_27 = arith.constant 0 : index
      %40 = vector.load %arg12[%c0_26, %c0_27] : memref<8x32xf32, #tpu.memory_space<vmem>>, vector<8x32xf32>
      %41 = arith.truncf %40 : vector<8x32xf32> to vector<8x32xbf16>
      %c0_28 = arith.constant 0 : index
      %c0_29 = arith.constant 0 : index
      %42 = vector.load %arg8[%c0_28, %c0_29] : memref<8x32xf32, #tpu.memory_space<vmem>>, vector<8x32xf32>
      %c0_30 = arith.constant 0 : index
      %c0_31 = arith.constant 0 : index
      %43 = vector.load %arg7[%c0_30, %c0_31] : memref<1x32xf32, #tpu.memory_space<vmem>>, vector<1x32xf32>
      %44 = vector.broadcast %43 : vector<1x32xf32> to vector<8x32xf32>
      %45 = arith.addf %42, %44 : vector<8x32xf32>
      %c0_32 = arith.constant 0 : index
      %c0_33 = arith.constant 0 : index
      %46 = vector.load %arg6[%c0_32, %c0_33] : memref<32x32xbf16, #tpu.memory_space<vmem>>, vector<32x32xbf16>
      %cst = arith.constant dense<0.000000e+00> : vector<8x32xf32>
      %47 = tpu.matmul %41, %46, %cst {dimension_numbers = #tpu.dot_dimension_numbers<[1], [0], [0], [1], [0, 0, 1, 1], [], []>} : vector<8x32xbf16>, vector<32x32xbf16>, vector<8x32xf32> -> vector<8x32xf32>
      %48 = arith.addf %45, %47 : vector<8x32xf32>
      %c0_34 = arith.constant 0 : index
      %c0_35 = arith.constant 0 : index
      %49 = vector.load %arg9[%c0_34, %c0_35] : memref<8x32xf32, #tpu.memory_space<vmem>>, vector<8x32xf32>
      tpu.vector_store %arg9[%c0_34, %c0_35], %48 {strides = array<i32>} : memref<8x32xf32, #tpu.memory_space<vmem>>, vector<8x32xf32>,
    } else {
    }
    return
  }
  func.func @transform_0(%arg0: i32, %arg1: i32, %arg2: i32) -> (i32, i32, i32) {
    %c1_i32 = arith.constant 1 : i32
    %0 = arith.muli %arg0, %c1_i32 : i32
    %1 = arith.addi %0, %arg1 : i32
    %c0_i32 = arith.constant 0 : i32
    %c0_i32_0 = arith.constant 0 : i32
    %c0_i32_1 = arith.constant 0 : i32
    return %c0_i32, %1, %c0_i32_0 : i32, i32, i32
  }
  func.func @transform_1(%arg0: i32, %arg1: i32, %arg2: i32) -> (i32, i32, i32) {
    %c1_i32 = arith.constant 1 : i32
    %0 = arith.muli %arg0, %c1_i32 : i32
    %1 = arith.minsi %arg2, %arg1 : i32
    %2 = arith.addi %0, %1 : i32
    %c1_i32_0 = arith.constant 1 : i32
    %c0_i32 = arith.constant 0 : i32
    %c0_i32_1 = arith.constant 0 : i32
    return %c1_i32_0, %2, %c0_i32 : i32, i32, i32
  }
  func.func @transform_2(%arg0: i32, %arg1: i32, %arg2: i32) -> (i32, i32, i32) {
    %c1_i32 = arith.constant 1 : i32
    %0 = arith.muli %arg0, %c1_i32 : i32
    %1 = arith.minsi %arg2, %arg1 : i32
    %2 = arith.addi %0, %1 : i32
    %c2_i32 = arith.constant 2 : i32
    %c0_i32 = arith.constant 0 : i32
    %c0_i32_0 = arith.constant 0 : i32
    return %c2_i32, %2, %c0_i32 : i32, i32, i32
  }
  func.func @transform_3(%arg0: i32, %arg1: i32, %arg2: i32) -> (i32, i32) {
    %c0_i32 = arith.constant 0 : i32
    %c0_i32_0 = arith.constant 0 : i32
    %c0_i32_1 = arith.constant 0 : i32
    return %c0_i32, %c0_i32_0 : i32, i32
  }
  func.func @transform_4(%arg0: i32, %arg1: i32, %arg2: i32) -> (i32, i32) {
    %c0_i32 = arith.constant 0 : i32
    %c0_i32_0 = arith.constant 0 : i32
    %c0_i32_1 = arith.constant 0 : i32
    return %c0_i32, %c0_i32_0 : i32, i32
  }
  func.func @transform_5(%arg0: i32, %arg1: i32, %arg2: i32) -> (i32, i32) {
    %c1_i32 = arith.constant 1 : i32
    %0 = arith.muli %arg0, %c1_i32 : i32
    %1 = arith.addi %0, %arg1 : i32
    %c0_i32 = arith.constant 0 : i32
    %c0_i32_0 = arith.constant 0 : i32
    return %1, %c0_i32 : i32, i32
  }
  func.func @transform_6(%arg0: i32, %arg1: i32, %arg2: i32) -> (i32, i32) {
    %c1_i32 = arith.constant 1 : i32
    %0 = arith.muli %arg0, %c1_i32 : i32
    %1 = arith.addi %0, %arg1 : i32
    %c0_i32 = arith.constant 0 : i32
    %c0_i32_0 = arith.constant 0 : i32
    return %1, %c0_i32 : i32, i32
  }
}

module attributes {stable_mosaic.version = 11 : i64} {
  func.func @_linear_kernel(%arg0: i32, %arg1: i32, %arg2: i32, %arg3: memref<16x32xf32, #tpu.memory_space<vmem>>, %arg4: memref<32x128xbf16, #tpu.memory_space<vmem>>, %arg5: memref<1x32xf32, #tpu.memory_space<vmem>>, %arg6: memref<1x32xf32, #tpu.memory_space<vmem>>, %arg7: memref<16x128xf32, #tpu.memory_space<vmem>>, %arg8: memref<16x128xf32, #tpu.memory_space<vmem>>, %arg9: memref<16x32xbf16, #tpu.memory_space<vmem>>) attributes {dimension_semantics = [#tpu.dimension_semantics<parallel>, #tpu.dimension_semantics<arbitrary>, #tpu.dimension_semantics<arbitrary>], iteration_bounds = array<i64: 1, 1, 1>, scalar_prefetch = 0 : i64, scratch_operands = 2 : i64, tpu.core_type = #tpu.core_type<tc>, window_params = [{transform_indices = @transform_0, window_bounds = array<i64: 16, 32>}, {transform_indices = @transform_1, window_bounds = array<i64: 32, 128>}, {pipeline_mode = #tpu.pipeline_mode<synchronous>, transform_indices = @transform_2, window_bounds = array<i64: 1, 32>}, {pipeline_mode = #tpu.pipeline_mode<synchronous>, transform_indices = @transform_3, window_bounds = array<i64: 1, 32>}, {transform_indices = @transform_4, window_bounds = array<i64: 16, 128>}]} {
    %c0_i32 = arith.constant 0 : i32
    %0 = arith.cmpi eq, %arg2, %c0_i32 : i32
    %1 = arith.extui %0 : i1 to i32
    %c0_i32_0 = arith.constant 0 : i32
    %2 = arith.cmpi ne, %1, %c0_i32_0 : i32
    scf.if %2 {
      %cst_13 = arith.constant 0.000000e+00 : f32
      %17 = vector.broadcast %cst_13 : f32 to vector<16x128xf32>
      %c0_14 = arith.constant 0 : index
      %c0_15 = arith.constant 0 : index
      %18 = vector.load %arg8[%c0_14, %c0_15] : memref<16x128xf32, #tpu.memory_space<vmem>>, vector<16x128xf32>
      tpu.vector_store %arg8[%c0_14, %c0_15], %17 {strides = array<i32>} : memref<16x128xf32, #tpu.memory_space<vmem>>, vector<16x128xf32>,
    } else {
    }
    %c0_i32_1 = arith.constant 0 : i32
    %3 = arith.cmpi eq, %arg1, %c0_i32_1 : i32
    %c0_i32_2 = arith.constant 0 : i32
    %4 = arith.cmpi eq, %arg2, %c0_i32_2 : i32
    %5 = arith.andi %3, %4 : i1
    %6 = arith.extui %5 : i1 to i32
    %c0_i32_3 = arith.constant 0 : i32
    %7 = arith.cmpi ne, %6, %c0_i32_3 : i32
    scf.if %7 {
      %c0_13 = arith.constant 0 : index
      %c0_14 = arith.constant 0 : index
      %17 = vector.load %arg3[%c0_13, %c0_14] : memref<16x32xf32, #tpu.memory_space<vmem>>, vector<16x32xf32>
      %cst_15 = arith.constant dense<0.000000e+00> : vector<16xf32>
      %18 = vector.multi_reduction <add>, %17, %cst_15 [1] : vector<16x32xf32> to vector<16xf32>
      %19 = vector.shape_cast %18 : vector<16xf32> to vector<16x1xf32>
      %cst_16 = arith.constant 3.200000e+01 : f32
      %20 = vector.broadcast %cst_16 : f32 to vector<16x1xf32>
      %21 = arith.divf %19, %20 : vector<16x1xf32>
      %22 = vector.broadcast %21 : vector<16x1xf32> to vector<16x32xf32>
      %23 = arith.subf %17, %22 : vector<16x32xf32>
      %24 = arith.mulf %23, %23 : vector<16x32xf32>
      %cst_17 = arith.constant dense<0.000000e+00> : vector<16xf32>
      %25 = vector.multi_reduction <add>, %24, %cst_17 [1] : vector<16x32xf32> to vector<16xf32>
      %26 = vector.shape_cast %25 : vector<16xf32> to vector<16x1xf32>
      %cst_18 = arith.constant 3.200000e+01 : f32
      %27 = vector.broadcast %cst_18 : f32 to vector<16x1xf32>
      %28 = arith.divf %26, %27 : vector<16x1xf32>
      %29 = vector.broadcast %21 : vector<16x1xf32> to vector<16x32xf32>
      %30 = arith.subf %17, %29 : vector<16x32xf32>
      %cst_19 = arith.constant 9.99999974E-6 : f32
      %31 = vector.broadcast %cst_19 : f32 to vector<16x1xf32>
      %32 = arith.addf %28, %31 : vector<16x1xf32>
      %33 = math.rsqrt %32 : vector<16x1xf32>
      %34 = vector.broadcast %33 : vector<16x1xf32> to vector<16x32xf32>
      %35 = arith.mulf %30, %34 : vector<16x32xf32>
      %c0_20 = arith.constant 0 : index
      %c0_21 = arith.constant 0 : index
      %36 = vector.load %arg5[%c0_20, %c0_21] : memref<1x32xf32, #tpu.memory_space<vmem>>, vector<1x32xf32>
      %37 = vector.broadcast %36 : vector<1x32xf32> to vector<16x32xf32>
      %38 = arith.mulf %35, %37 : vector<16x32xf32>
      %c0_22 = arith.constant 0 : index
      %c0_23 = arith.constant 0 : index
      %39 = vector.load %arg6[%c0_22, %c0_23] : memref<1x32xf32, #tpu.memory_space<vmem>>, vector<1x32xf32>
      %40 = vector.broadcast %39 : vector<1x32xf32> to vector<16x32xf32>
      %41 = arith.addf %38, %40 : vector<16x32xf32>
      %42 = arith.truncf %41 : vector<16x32xf32> to vector<16x32xbf16>
      %c0_24 = arith.constant 0 : index
      %c0_25 = arith.constant 0 : index
      %43 = vector.load %arg9[%c0_24, %c0_25] : memref<16x32xbf16, #tpu.memory_space<vmem>>, vector<16x32xbf16>
      tpu.vector_store %arg9[%c0_24, %c0_25], %42 {strides = array<i32>} : memref<16x32xbf16, #tpu.memory_space<vmem>>, vector<16x32xbf16>,
    } else {
    }
    %c0 = arith.constant 0 : index
    %c0_4 = arith.constant 0 : index
    %8 = vector.load %arg9[%c0, %c0_4] : memref<16x32xbf16, #tpu.memory_space<vmem>>, vector<16x32xbf16>
    %c0_5 = arith.constant 0 : index
    %c0_6 = arith.constant 0 : index
    %9 = vector.load %arg8[%c0_5, %c0_6] : memref<16x128xf32, #tpu.memory_space<vmem>>, vector<16x128xf32>
    %c0_7 = arith.constant 0 : index
    %c0_8 = arith.constant 0 : index
    %10 = vector.load %arg4[%c0_7, %c0_8] : memref<32x128xbf16, #tpu.memory_space<vmem>>, vector<32x128xbf16>
    %cst = arith.constant dense<0.000000e+00> : vector<16x128xf32>
    %11 = tpu.matmul %8, %10, %cst {dimension_numbers = #tpu.dot_dimension_numbers<[1], [0], [0], [1], [0, 0, 1, 1], [], []>} : vector<16x32xbf16>, vector<32x128xbf16>, vector<16x128xf32> -> vector<16x128xf32>
    %12 = arith.addf %9, %11 : vector<16x128xf32>
    %c0_9 = arith.constant 0 : index
    %c0_10 = arith.constant 0 : index
    %13 = vector.load %arg8[%c0_9, %c0_10] : memref<16x128xf32, #tpu.memory_space<vmem>>, vector<16x128xf32>
    tpu.vector_store %arg8[%c0_9, %c0_10], %12 {strides = array<i32>} : memref<16x128xf32, #tpu.memory_space<vmem>>, vector<16x128xf32>,
    %c0_i32_11 = arith.constant 0 : i32
    %14 = arith.cmpi eq, %arg2, %c0_i32_11 : i32
    %15 = arith.extui %14 : i1 to i32
    %c0_i32_12 = arith.constant 0 : i32
    %16 = arith.cmpi ne, %15, %c0_i32_12 : i32
    scf.if %16 {
      %c0_13 = arith.constant 0 : index
      %c0_14 = arith.constant 0 : index
      %17 = vector.load %arg8[%c0_13, %c0_14] : memref<16x128xf32, #tpu.memory_space<vmem>>, vector<16x128xf32>
      %c0_15 = arith.constant 0 : index
      %c0_16 = arith.constant 0 : index
      %18 = vector.load %arg7[%c0_15, %c0_16] : memref<16x128xf32, #tpu.memory_space<vmem>>, vector<16x128xf32>
      tpu.vector_store %arg7[%c0_15, %c0_16], %17 {strides = array<i32>} : memref<16x128xf32, #tpu.memory_space<vmem>>, vector<16x128xf32>,
    } else {
    }
    return
  }
  func.func @transform_0(%arg0: i32, %arg1: i32, %arg2: i32) -> (i32, i32) {
    %c0_i32 = arith.constant 0 : i32
    return %arg0, %arg2 : i32, i32
  }
  func.func @transform_1(%arg0: i32, %arg1: i32, %arg2: i32) -> (i32, i32) {
    %c0_i32 = arith.constant 0 : i32
    return %arg2, %arg1 : i32, i32
  }
  func.func @transform_2(%arg0: i32, %arg1: i32, %arg2: i32) -> (i32, i32) {
    %c0_i32 = arith.constant 0 : i32
    %c0_i32_0 = arith.constant 0 : i32
    %c0_i32_1 = arith.constant 0 : i32
    return %c0_i32, %c0_i32_0 : i32, i32
  }
  func.func @transform_3(%arg0: i32, %arg1: i32, %arg2: i32) -> (i32, i32) {
    %c0_i32 = arith.constant 0 : i32
    %c0_i32_0 = arith.constant 0 : i32
    %c0_i32_1 = arith.constant 0 : i32
    return %c0_i32, %c0_i32_0 : i32, i32
  }
  func.func @transform_4(%arg0: i32, %arg1: i32, %arg2: i32) -> (i32, i32) {
    %c0_i32 = arith.constant 0 : i32
    return %arg0, %arg1 : i32, i32
  }
}

</mosaic_0001>

<bundles_post_ra>
// kernel: gpt_forward.9
= control target key start
LH: loop header
LB: loop body
LE: loop exit
PB: predicated region body
PF: predicated region fallthrough
CT: control target
= control target key end

     0   :  { %s731_s18 = smov 0   ;;  %s733_s19 = smov 0   ;;  %s801_s0 = inlined_call_operand.vmem [shape: f32[16,32], index: 0, kind: input, shape index: {}]   ;;  %s802_s1 = inlined_call_operand.vmem [shape: f32[1,32], index: 1, kind: input, shape index: {}]   ;;  %s803_s2 = inlined_call_operand.vmem [shape: f32[1,32], index: 2, kind: input, shape index: {}]   ;;  %s804_s3 = inlined_call_operand.vmem [shape: bf16[3,32,32], index: 3, kind: input, shape index: {}]   ;;  %s805_s4 = inlined_call_operand.vmem [shape: f32[3,1,32], index: 4, kind: input, shape index: {}]   ;;  %s806_s5 = inlined_call_operand.vmem [shape: bf16[3,16,32], index: 5, kind: output, shape index: {}]  }
   0x1   :  { %s735_s20 = smov 0  }
   0x2 LB: > { %s30_s21 = sadd.s32 1, %s693_s19  ;;  %p605_p0 = scmp.ge.s32.totalorder %s697_s20, 1  ;;  %s697_s20 = sphi %s735_s20, %s15_s20   ;;  %s693_s19 = sphi %s733_s19, %s808_s19   ;;  %s689_s18 = sphi %s731_s18, %s807_s18  }
   0x3   : > { %p32_p1 = scmp.ge.s32.totalorder %s30_s21, 3  ;;  %p239_p2 = scmp.lt.s32.totalorder %s697_s20, 4 }
   0x5   : > { %s810_s21 = smov (%p32_p1, %s30_s21), 0  ;;  %p240_p3 = pnand %p605_p0, %p239_p2 }
   0x6   : > { %p294_p4 = scmp.lt.s32.totalorder (!%p240_p3), %s689_s18, 2  ;;  %p322_p5 = scmp.eq.s32.totalorder (!%p240_p3), %s689_s18, 0 }
   0x7   : > { %243 = sbr.rel (%p240_p3) target bundleno = 539 (0x21b), region = 40 }
   0xc   : > { %s812_s18 = smov (!%p294_p4, %s689_s18), 2  ;;  %327 = sbr.rel (!%p322_p5) target bundleno = 328 (0x148), region = 44  ;;  %v328_v0 = vld [vmem:[%s801_s0] sm:$0xff] (%p322_p5)  ;;  %vm330_vm0 = vcmask (%p322_p5), 261120   ;;  %v329_v1 = vld [vmem:[%s801_s0 + $0x8] sm:$0xff] (%p322_p5)  ;;  %vm384_vm1 = vcmask (%p322_p5), 257024  }
   0xd   : > { %s624_s22 = sshll.u32 %s812_s18, 4  ;;  %s307_s25 = scalar_lea.vmem %s805_s4, %s812_s18  ;;  %v331_v2 = vsel (%p322_p5), %vm330_vm0, %v328_v0, 0.0  ;;  %v334_v3 = vsel (%p322_p5), %vm330_vm0, %v329_v1, 0.0  ;;  %v611_v21 = vld [vmem:[%s802_s1] ss:$0 sm:$0xff] (%p322_p5) }
   0xe   : > { %s759_s28 = scalar_lea.vmem %s804_s3, %s624_s22  ;;  %s625_s29 = sshll.u32 %s812_s18, 3  ;;  %332 = vadd.xlane.f32.xlu0 (%p322_p5), %v331_v2  ;;  %v612_v23 = vld [vmem:[%s803_s2] ss:$0 sm:$0xff] (%p322_p5) }
   0xf   : > { %s765_s7 = scalar_lea.vmem %s806_s5, %s625_s29 }
  0x12   : > { %335 = vadd.xlane.f32.xlu0 %v334_v3 }
  0x97   : > { %v333_v4 = vpop.xlane.xlu0 %332 }
  0x98   : > { %v338_v5 = vmul.f32 0.03125, %v333_v4 }
  0x9a   : > { %v340_v6 = vsub.f32 %v328_v0, %v338_v5 }
  0x9b   : > { %v336_v7 = vpop.xlane.xlu0 %335 }
  0x9c   : > { %v339_v8 = vmul.f32 0.03125, %v336_v7  ;;  %v342_v9 = vmul.f32 %v340_v6, %v340_v6 }
  0x9e   : > { %v341_v10 = vsub.f32 %v329_v1, %v339_v8  ;;  %v344_v11 = vsel %vm330_vm0, %v342_v9, 0.0 }
  0x9f   : > { %345 = vadd.xlane.f32.xlu1 %v344_v11 }
  0xa0   : > { %v343_v12 = vmul.f32 %v341_v10, %v341_v10 }
  0xa2   : > { %v347_v13 = vsel %vm330_vm0, %v343_v12, 0.0 }
  0xa3   : > { %348 = vadd.xlane.f32.xlu1 %v347_v13 }
 0x128   : > { %v346_v14 = vpop.xlane.xlu1 %345 }
 0x129   : > { %v350_v15 = vmul.f32 0.03125, %v346_v14 }
 0x12b   : > { %v352_v16 = vadd.f32 1e-05, %v350_v15 }
 0x12c   : > { %v349_v17 = vpop.xlane.xlu1 %348 }
 0x12d   : > { %668 = vrsqrt.f32 %v352_v16  ;;  %v351_v18 = vmul.f32 0.03125, %v349_v17 }
 0x12f   : > { %v353_v19 = vadd.f32 1e-05, %v351_v18 }
 0x131   : > { %670 = vrsqrt.f32 %v353_v19 }
 0x13a   : > { %v669_v20 = vpop.eup %668 }
 0x13b   : > { %v356_v22 = vmul.f32 %v669_v20, %v340_v6 }
 0x13d   : > { %v365_v24 = vmul.f32 %v611_v21, %v356_v22 }
 0x13e   : > { %v671_v25 = vpop.eup %670 }
 0x13f   : > { %v374_v26 = vadd.f32 %v612_v23, %v365_v24  ;;  %v357_v27 = vmul.f32 %v671_v25, %v341_v10 }
 0x141   : > { %v627_v28 = vpack.c.bf16 %v374_v26, %v374_v26  ;;  %v366_v29 = vmul.f32 %v611_v21, %v357_v27 }
 0x143   : > { %385 = vst.msk [vmem:[#allocation2] sm:$0xf] %vm384_vm1, %v627_v28  ;;  %v375_v30 = vadd.f32 %v612_v23, %v366_v29 }
 0x145   : > { %v628_v31 = vpack.c.bf16 %v375_v30, %v375_v30 }
 0x147   : > { %386 = vst.msk [vmem:[#allocation2 + $0x4] sm:$0xf] %vm384_vm1, %v628_v31 }
 0x148 PF: > { %v672_v32 = vld [vmem:[%s759_s28 + $0x8] sm:$0xff]   ;;  %v699_v33 = vmov 0.0   ;;  %v673_v34 = vld [vmem:[%s759_s28] sm:$0xff]   ;;  %vm700_vm2 = vmmov 0   ;;  %vm417_vm3 = vcmask 261120   ;;  %vm470_vm4 = vcmask 257024  }
 0x149   : > { %634 = vmatprep.subr.bf16.mxu0 %v699_v33  ;;  %638 = vmatprep.mubr.msk.bf16.mxu0 %vm700_vm2, %v699_v33  ;;  %v615_v36 = vld [vmem:[%s307_s25] ss:$0 sm:$0xff] }
 0x14a   : > { %635 = vmatpush3.bf16.msra.mxu0 %v672_v32 }
 0x14b   : > { %636 = vmatprep.subr.bf16.mxu0 %v699_v33 }
 0x14e   : > { %v674_v35 = vld [vmem:[#allocation2] sm:$0xff]   ;;  %637 = vmatpush3.bf16.msra.mxu0 %v673_v34 }
 0x151   : > { %639 = vmatmul.mubr.msk.bf16.vlgmr.msra.gmra.mxu0 %vm417_vm3, %v674_v35 }
 0x211   : > { %v455_v37 = vpop.f32.mrf.mxu0 }
 0x212   : > { %v456_v38 = vadd.f32 %v615_v36, %v455_v37 }
 0x213   : > { %v640_v39 = vpop.f32.mrf.mxu0 }
 0x214   : > { %v629_v40 = vpack.c.bf16 %v456_v38, %v456_v38 }
 0x215   : > { %v458_v41 = vpop.f32.mrf.mxu0 }
 0x216   : > { %471 = vst.msk [vmem:[%s765_s7] sm:$0xf] %vm470_vm4, %v629_v40  ;;  %v459_v42 = vadd.f32 %v615_v36, %v458_v41 }
 0x217   : > { %v641_v43 = vpop.f32.mrf.mxu0 }
 0x218   : > { %v630_v44 = vpack.c.bf16 %v459_v42, %v459_v42 }
 0x21a   : > { %472 = vst.msk [vmem:[%s765_s7 + $0x4] sm:$0xf] %vm470_vm4, %v630_v44 }
 0x21b PF: > { %s15_s20 = sadd.s32 1, %s697_s20   ;;  %s807_s18 = smov %s693_s19 }
 0x21c   : > { %p12_p6 = scmp.ge.s32.totalorder %s15_s20, 5   ;;  %s808_s19 = smov %s810_s21 }
 0x21e   :  { %14 = sbr.rel (!%p12_p6) target bundleno = 2 (0x2), region = 80 }

// kernel: gpt_forward.12
= control target key start
LH: loop header
LB: loop body
LE: loop exit
PB: predicated region body
PF: predicated region fallthrough
CT: control target
= control target key end

     0   :  { %vm22_vm0 = vcmask 261120   ;;  %v219_v0 = vmov 0.0   ;;  %vm220_vm1 = vmmov 0   ;;  %s294_s1 = inlined_call_operand.vmem [shape: bf16[128,32], index: 1, kind: input, shape index: {}]   ;;  %s295_s0 = inlined_call_operand.vmem [shape: bf16[16,128], index: 0, kind: input, shape index: {}]   ;;  %s296_s2 = inlined_call_operand.vmem [shape: f32[1,32], index: 2, kind: input, shape index: {}]   ;;  %s297_s3 = inlined_call_operand.vmem [shape: f32[16,32], index: 3, kind: input, shape index: {}]   ;;  %s298_s4 = inlined_call_operand.vmem [shape: f32[16,32], index: 4, kind: output, shape index: {}]  }
   0x1   :  { %188 = vmatprep.subr.bf16.mxu0 %v219_v0  ;;  %v210_v1 = vld [vmem:[%s294_s1 + $0x38] sm:$0xff]   ;;  %204 = vmatprep.mubr.msk.bf16.mxu0 %vm220_vm1, %v219_v0  ;;  %23 = vst.msk [vmem:[#allocation2] sm:$0xff] %vm22_vm0, %v219_v0  ;;  %24 = vst.msk [vmem:[#allocation2 + $0x8] sm:$0xff] %vm22_vm0, %v219_v0  ;;  %v211_v2 = vld [vmem:[%s294_s1 + $0x30] sm:$0xff]  }
   0x2   :  { %189 = vmatpush3.bf16.msra.mxu0 %v210_v1  ;;  %v212_v3 = vld [vmem:[%s294_s1 + $0x28] sm:$0xff]   ;;  %v213_v4 = vld [vmem:[%s294_s1 + $0x20] sm:$0xff]   ;;  %v214_v5 = vld [vmem:[%s294_s1 + $0x18] sm:$0xff]  }
   0x3   :  { %190 = vmatprep.subr.bf16.mxu0 %v219_v0  ;;  %v215_v6 = vld [vmem:[%s294_s1 + $0x10] sm:$0xff]   ;;  %v216_v7 = vld [vmem:[%s294_s1 + $0x8] sm:$0xff]   ;;  %v217_v8 = vld [vmem:[%s294_s1] sm:$0xff]  }
   0x4   :  { %v218_v9 = vld [vmem:[%s295_s0] sm:$0xff]   ;;  %v160_v23 = vld [vmem:[%s297_s3 + $0x8] sm:$0xff] }
   0x5   :  { %v178_v18 = vld [vmem:[%s296_s2] ss:$0 sm:$0xff] }
   0x6   :  { %191 = vmatpush3.bf16.msra.mxu0 %v211_v2  ;;  %v159_v20 = vld [vmem:[%s297_s3] sm:$0xff] }
   0x7   :  { %192 = vmatprep.subr.bf16.mxu0 %v219_v0 }
   0x8   :  { %v27_v10 = vld [vmem:[#allocation2] sm:$0xff]  ;;  %v28_v14 = vld [vmem:[#allocation2 + $0x8] sm:$0xff] }
   0xa   :  { %193 = vmatpush3.bf16.msra.mxu0 %v212_v3 }
   0xb   :  { %194 = vmatprep.subr.bf16.mxu0 %v219_v0 }
   0xe   :  { %195 = vmatpush3.bf16.msra.mxu0 %v213_v4 }
   0xf   :  { %196 = vmatprep.subr.bf16.mxu0 %v219_v0 }
  0x12   :  { %197 = vmatpush3.bf16.msra.mxu0 %v214_v5 }
  0x13   :  { %198 = vmatprep.subr.bf16.mxu0 %v219_v0 }
  0x16   :  { %199 = vmatpush3.bf16.msra.mxu0 %v215_v6 }
  0x17   :  { %200 = vmatprep.subr.bf16.mxu0 %v219_v0 }
  0x1a   :  { %201 = vmatpush3.bf16.msra.mxu0 %v216_v7 }
  0x1b   :  { %202 = vmatprep.subr.bf16.mxu0 %v219_v0 }
  0x1e   :  { %203 = vmatpush3.bf16.msra.mxu0 %v217_v8 }
  0x21   :  { %205 = vmatmul.mubr.bf16.vlgmr.msra.gmra.mxu0 %v218_v9 }
  0xe1   :  { %v133_v11 = vpop.f32.mrf.mxu0 }
  0xe2   :  { %v140_v12 = vadd.f32 %v133_v11, %v27_v10 }
  0xe3   :  { %v206_v13 = vpop.f32.mrf.mxu0 }
  0xe4   :  { %143 = vst.msk [vmem:[#allocation2] sm:$0xff] %vm22_vm0, %v140_v12 }
  0xe5   :  { %v136_v15 = vpop.f32.mrf.mxu0 }
  0xe6   :  { %v141_v16 = vadd.f32 %v136_v15, %v28_v14 }
  0xe7   :  { %v207_v17 = vpop.f32.mrf.mxu0 }
  0xe8   :  { %144 = vst.msk [vmem:[#allocation2 + $0x8] sm:$0xff] %vm22_vm0, %v141_v16 }
  0xeb   :  { %v148_v19 = vld [vmem:[#allocation2] sm:$0xff] }
  0xec   :  { %v157_v21 = vadd.f32 %v178_v18, %v148_v19 }
  0xee   :  { %v161_v22 = vadd.f32 %v159_v20, %v157_v21 }
  0xef   :  { %v149_v24 = vld [vmem:[#allocation2 + $0x8] sm:$0xff] }
  0xf0   :  { %163 = vst.msk [vmem:[%s298_s4] sm:$0xff] %vm22_vm0, %v161_v22  ;;  %v158_v25 = vadd.f32 %v178_v18, %v149_v24 }
  0xf2   :  { %v162_v26 = vadd.f32 %v160_v23, %v158_v25 }
  0xf4   :  { %164 = vst.msk [vmem:[%s298_s4 + $0x8] sm:$0xff] %vm22_vm0, %v162_v26 }

// kernel: gpt_forward.11
= control target key start
LH: loop header
LB: loop body
LE: loop exit
PB: predicated region body
PF: predicated region fallthrough
CT: control target
= control target key end

     0   :  { %vm34_vm0 = vcmask 261120   ;;  %v255_v15 = vmov 0.0   ;;  %vm256_vm1 = vmmov 0   ;;  %vm88_vm2 = vcmask 257024   ;;  %s316_s0 = inlined_call_operand.vmem [shape: f32[16,32], index: 0, kind: input, shape index: {}]   ;;  %s317_s1 = inlined_call_operand.vmem [shape: bf16[32,128], index: 1, kind: input, shape index: {}]   ;;  %s318_s2 = inlined_call_operand.vmem [shape: f32[1,32], index: 2, kind: input, shape index: {}]   ;;  %s319_s3 = inlined_call_operand.vmem [shape: f32[1,32], index: 3, kind: input, shape index: {}]   ;;  %s320_s4 = inlined_call_operand.vmem [shape: f32[1,128], index: 4, kind: input, shape index: {}]   ;;  %s321_s5 = inlined_call_operand.vmem [shape: bf16[16,128], index: 5, kind: output, shape index: {}]  }
   0x1   :  { %v32_v0 = vld [vmem:[%s316_s0] sm:$0xff]  ;;  %v33_v1 = vld [vmem:[%s316_s0 + $0x8] sm:$0xff]  ;;  %234 = vmatprep.subr.bf16.mxu0 %v255_v15  ;;  %238 = vmatprep.mubr.msk.bf16.mxu0 %vm256_vm1, %v255_v15 }
   0x2   :  { %v35_v2 = vsel %vm34_vm0, %v32_v0, 0.0  ;;  %v38_v3 = vsel %vm34_vm0, %v33_v1, 0.0  ;;  %v244_v14 = vld [vmem:[%s317_s1 + $0x8] sm:$0xff]   ;;  %v245_v16 = vld [vmem:[%s317_s1] sm:$0xff]  }
   0x3   :  { %36 = vadd.xlane.f32.xlu0 %v35_v2  ;;  %235 = vmatpush3.bf16.msra.mxu0 %v244_v14  ;;  %v211_v24 = vld [vmem:[%s318_s2] ss:$0 sm:$0xff] }
   0x4   :  { %236 = vmatprep.subr.bf16.mxu0 %v255_v15  ;;  %v212_v26 = vld [vmem:[%s319_s3] ss:$0 sm:$0xff] }
   0x5   :  { %v219_v36 = vld [vmem:[%s320_s4] ss:$0 sm:$0xff] }
   0x7   :  { %39 = vadd.xlane.f32.xlu0 %v38_v3  ;;  %237 = vmatpush3.bf16.msra.mxu0 %v245_v16 }
  0x8c   :  { %v37_v4 = vpop.xlane.xlu0 %36 }
  0x8d   :  { %v42_v5 = vmul.f32 0.03125, %v37_v4 }
  0x8f   :  { %v44_v6 = vsub.f32 %v32_v0, %v42_v5 }
  0x90   :  { %v40_v7 = vpop.xlane.xlu0 %39 }
  0x91   :  { %v43_v8 = vmul.f32 0.03125, %v40_v7  ;;  %v46_v9 = vmul.f32 %v44_v6, %v44_v6 }
  0x93   :  { %v45_v10 = vsub.f32 %v33_v1, %v43_v8  ;;  %v48_v11 = vsel %vm34_vm0, %v46_v9, 0.0 }
  0x94   :  { %49 = vadd.xlane.f32.xlu1 %v48_v11 }
  0x95   :  { %v47_v12 = vmul.f32 %v45_v10, %v45_v10 }
  0x97   :  { %v51_v13 = vsel %vm34_vm0, %v47_v12, 0.0 }
  0x98   :  { %52 = vadd.xlane.f32.xlu1 %v51_v13 }
 0x11d   :  { %v50_v17 = vpop.xlane.xlu1 %49 }
 0x11e   :  { %v54_v18 = vmul.f32 0.03125, %v50_v17 }
 0x120   :  { %v56_v19 = vadd.f32 1e-05, %v54_v18 }
 0x121   :  { %v53_v20 = vpop.xlane.xlu1 %52 }
 0x122   :  { %247 = vrsqrt.f32 %v56_v19  ;;  %v55_v21 = vmul.f32 0.03125, %v53_v20 }
 0x124   :  { %v57_v22 = vadd.f32 1e-05, %v55_v21 }
 0x126   :  { %249 = vrsqrt.f32 %v57_v22 }
 0x12f   :  { %v248_v23 = vpop.eup %247 }
 0x130   :  { %v60_v25 = vmul.f32 %v248_v23, %v44_v6 }
 0x132   :  { %v69_v27 = vmul.f32 %v211_v24, %v60_v25 }
 0x133   :  { %v250_v28 = vpop.eup %249 }
 0x134   :  { %v78_v29 = vadd.f32 %v212_v26, %v69_v27  ;;  %v61_v30 = vmul.f32 %v250_v28, %v45_v10 }
 0x136   :  { %v222_v31 = vpack.c.bf16 %v78_v29, %v78_v29  ;;  %v70_v32 = vmul.f32 %v211_v24, %v61_v30 }
 0x138   :  { %89 = vst.msk [vmem:[#allocation3] sm:$0xf] %vm88_vm2, %v222_v31  ;;  %v79_v33 = vadd.f32 %v212_v26, %v70_v32 }
 0x13a   :  { %v223_v34 = vpack.c.bf16 %v79_v33, %v79_v33 }
 0x13c   :  { %90 = vst.msk [vmem:[#allocation3 + $0x4] sm:$0xf] %vm88_vm2, %v223_v34 }
 0x143   :  { %v246_v35 = vld [vmem:[#allocation3] sm:$0xff]  }
 0x144   :  { %239 = vmatmul.mubr.msk.bf16.vlgmr.msra.gmra.mxu0 %vm34_vm0, %v246_v35 }
 0x204   :  { %v154_v37 = vpop.f32.mrf.mxu0 }
 0x205   :  { %v177_v38 = vadd.f32 %v219_v36, %v154_v37 }
 0x206   :  { %v240_v39 = vpop.f32.mrf.mxu0 }
 0x207   :  { %v179_v40 = vmul.f32 %v177_v38, %v177_v38 }
 0x208   :  { %v157_v41 = vpop.f32.mrf.mxu0 }
 0x209   :  { %v181_v42 = vmul.f32 %v179_v40, %v177_v38  ;;  %v178_v43 = vadd.f32 %v219_v36, %v157_v41 }
 0x20a   :  { %v241_v44 = vpop.f32.mrf.mxu0 }
 0x20b   :  { %v183_v45 = vmul.f32 0.044715, %v181_v42  ;;  %v180_v46 = vmul.f32 %v178_v43, %v178_v43 }
 0x20d   :  { %v185_v47 = vadd.f32 %v183_v45, %v177_v38  ;;  %v182_v48 = vmul.f32 %v180_v46, %v178_v43 }
 0x20f   :  { %v187_v49 = vmul.f32 0.7978846, %v185_v47  ;;  %v184_v50 = vmul.f32 0.044715, %v182_v48 }
 0x211   :  { %251 = vtanh.f32 %v187_v49  ;;  %v186_v51 = vadd.f32 %v184_v50, %v178_v43 }
 0x213   :  { %v188_v52 = vmul.f32 0.7978846, %v186_v51 }
 0x215   :  { %253 = vtanh.f32 %v188_v52 }
 0x21e   :  { %v252_v53 = vpop.eup %251 }
 0x21f   :  { %v191_v54 = vadd.f32 1.0, %v252_v53 }
 0x221   :  { %v193_v56 = vmul.f32 0.5, %v191_v54 }
 0x222   :  { %v254_v55 = vpop.eup %253 }
 0x223   :  { %v192_v57 = vadd.f32 1.0, %v254_v55  ;;  %v195_v59 = vmul.f32 %v193_v56, %v177_v38 }
 0x225   :  { %v194_v58 = vmul.f32 0.5, %v192_v57 }
 0x227   :  { %v196_v60 = vmul.f32 %v194_v58, %v178_v43 }
 0x229   :  { %v229_v61 = vpack.c.bf16 %v196_v60, %v195_v59 }
 0x22b   :  { %230 = vst [vmem:[%s321_s5] sm:$0xff] %v229_v61  }

// kernel: gpt_forward.17
= control target key start
LH: loop header
LB: loop body
LE: loop exit
PB: predicated region body
PF: predicated region fallthrough
CT: control target
= control target key end

     0   :  { %vm31_vm0 = vcmask 261120   ;;  %v203_v15 = vmov 0.0   ;;  %vm204_vm1 = vmmov 0   ;;  %vm85_vm2 = vcmask 257024   ;;  %s259_s0 = inlined_call_operand.vmem [shape: f32[16,32], index: 0, kind: input, shape index: {}]   ;;  %s260_s1 = inlined_call_operand.vmem [shape: bf16[32,128], index: 1, kind: input, shape index: {}]   ;;  %s261_s2 = inlined_call_operand.vmem [shape: f32[1,32], index: 2, kind: input, shape index: {}]   ;;  %s262_s3 = inlined_call_operand.vmem [shape: f32[1,32], index: 3, kind: input, shape index: {}]   ;;  %s263_s4 = inlined_call_operand.vmem [shape: f32[16,128], index: 4, kind: output, shape index: {}]  }
   0x1   :  { %v29_v0 = vld [vmem:[%s259_s0] sm:$0xff]  ;;  %v30_v1 = vld [vmem:[%s259_s0 + $0x8] sm:$0xff]  ;;  %186 = vmatprep.subr.bf16.mxu0 %v203_v15  ;;  %190 = vmatprep.mubr.msk.bf16.mxu0 %vm204_vm1, %v203_v15 }
   0x2   :  { %v32_v2 = vsel %vm31_vm0, %v29_v0, 0.0  ;;  %v35_v3 = vsel %vm31_vm0, %v30_v1, 0.0  ;;  %v196_v14 = vld [vmem:[%s260_s1 + $0x8] sm:$0xff]   ;;  %v197_v16 = vld [vmem:[%s260_s1] sm:$0xff]  }
   0x3   :  { %33 = vadd.xlane.f32.xlu0 %v32_v2  ;;  %187 = vmatpush3.bf16.msra.mxu0 %v196_v14  ;;  %v173_v24 = vld [vmem:[%s261_s2] ss:$0 sm:$0xff] }
   0x4   :  { %188 = vmatprep.subr.bf16.mxu0 %v203_v15  ;;  %v174_v26 = vld [vmem:[%s262_s3] ss:$0 sm:$0xff] }
   0x7   :  { %36 = vadd.xlane.f32.xlu0 %v35_v3  ;;  %189 = vmatpush3.bf16.msra.mxu0 %v197_v16 }
  0x8c   :  { %v34_v4 = vpop.xlane.xlu0 %33 }
  0x8d   :  { %v39_v5 = vmul.f32 0.03125, %v34_v4 }
  0x8f   :  { %v41_v6 = vsub.f32 %v29_v0, %v39_v5 }
  0x90   :  { %v37_v7 = vpop.xlane.xlu0 %36 }
  0x91   :  { %v40_v8 = vmul.f32 0.03125, %v37_v7  ;;  %v43_v9 = vmul.f32 %v41_v6, %v41_v6 }
  0x93   :  { %v42_v10 = vsub.f32 %v30_v1, %v40_v8  ;;  %v45_v11 = vsel %vm31_vm0, %v43_v9, 0.0 }
  0x94   :  { %46 = vadd.xlane.f32.xlu1 %v45_v11 }
  0x95   :  { %v44_v12 = vmul.f32 %v42_v10, %v42_v10 }
  0x97   :  { %v48_v13 = vsel %vm31_vm0, %v44_v12, 0.0 }
  0x98   :  { %49 = vadd.xlane.f32.xlu1 %v48_v13 }
 0x11d   :  { %v47_v17 = vpop.xlane.xlu1 %46 }
 0x11e   :  { %v51_v18 = vmul.f32 0.03125, %v47_v17 }
 0x120   :  { %v53_v19 = vadd.f32 1e-05, %v51_v18 }
 0x121   :  { %v50_v20 = vpop.xlane.xlu1 %49 }
 0x122   :  { %199 = vrsqrt.f32 %v53_v19  ;;  %v52_v21 = vmul.f32 0.03125, %v50_v20 }
 0x124   :  { %v54_v22 = vadd.f32 1e-05, %v52_v21 }
 0x126   :  { %201 = vrsqrt.f32 %v54_v22 }
 0x12f   :  { %v200_v23 = vpop.eup %199 }
 0x130   :  { %v57_v25 = vmul.f32 %v200_v23, %v41_v6 }
 0x132   :  { %v66_v27 = vmul.f32 %v173_v24, %v57_v25 }
 0x133   :  { %v202_v28 = vpop.eup %201 }
 0x134   :  { %v75_v29 = vadd.f32 %v174_v26, %v66_v27  ;;  %v58_v30 = vmul.f32 %v202_v28, %v42_v10 }
 0x136   :  { %v181_v31 = vpack.c.bf16 %v75_v29, %v75_v29  ;;  %v67_v32 = vmul.f32 %v173_v24, %v58_v30 }
 0x138   :  { %86 = vst.msk [vmem:[#allocation3] sm:$0xf] %vm85_vm2, %v181_v31  ;;  %v76_v33 = vadd.f32 %v174_v26, %v67_v32 }
 0x13a   :  { %v182_v34 = vpack.c.bf16 %v76_v33, %v76_v33 }
 0x13c   :  { %87 = vst.msk [vmem:[#allocation3 + $0x4] sm:$0xf] %vm85_vm2, %v182_v34 }
 0x143   :  { %v198_v35 = vld [vmem:[#allocation3] sm:$0xff]  }
 0x144   :  { %191 = vmatmul.mubr.msk.bf16.vlgmr.msra.gmra.mxu0 %vm31_vm0, %v198_v35 }
 0x204   :  { %v151_v36 = vpop.f32.mrf.mxu0 }
 0x205   :  { %167 = vst [vmem:[%s263_s4] sm:$0xff] %v151_v36 }
 0x206   :  { %v192_v37 = vpop.f32.mrf.mxu0 }
 0x208   :  { %v154_v38 = vpop.f32.mrf.mxu0 }
 0x209   :  { %168 = vst [vmem:[%s263_s4 + $0x8] sm:$0xff] %v154_v38 }
 0x20a   :  { %v193_v39 = vpop.f32.mrf.mxu0 }

// kernel: gpt_forward.10
= control target key start
LH: loop header
LB: loop body
LE: loop exit
PB: predicated region body
PF: predicated region fallthrough
CT: control target
= control target key end

     0   :  { %s2101_s21 = smov 0   ;;  %s2103_s22 = smov 0   ;;  %s2322_s0 = inlined_call_operand.vmem [shape: bf16[3,16,32], index: 0, kind: input, shape index: {}, may-alias: {0,1,2}]   ;;  %s2323_s1 = inlined_call_operand.vmem [shape: bf16[3,16,32], index: 1, kind: input, shape index: {}, may-alias: {0,1,2}]   ;;  %s2324_s2 = inlined_call_operand.vmem [shape: bf16[3,16,32], index: 2, kind: input, shape index: {}, may-alias: {0,1,2}]   ;;  %s2325_s3 = inlined_call_operand.vmem [shape: bf16[32,32], index: 3, kind: input, shape index: {}]   ;;  %s2326_s4 = inlined_call_operand.vmem [shape: f32[1,32], index: 4, kind: input, shape index: {}]   ;;  %s2327_s5 = inlined_call_operand.vmem [shape: f32[16,32], index: 5, kind: input, shape index: {}]   ;;  %s2328_s6 = inlined_call_operand.vmem [shape: f32[16,32], index: 6, kind: output, shape index: {}]  }
   0x1   :  { %s2105_s23 = smov 0  }
   0x2 LB: > { %s35_s24 = sadd.s32 1, %s2050_s22  ;;  %p1824_p0 = scmp.ge.s32.totalorder %s2054_s23, 1  ;;  %s2054_s23 = sphi %s2105_s23, %s16_s23   ;;  %s2050_s22 = sphi %s2103_s22, %s2330_s22   ;;  %s2046_s21 = sphi %s2101_s21, %s2329_s21  }
   0x3   : > { %p37_p1 = scmp.ge.s32.totalorder %s35_s24, 2  ;;  %p293_p2 = scmp.lt.s32.totalorder %s2054_s23, 3 }
   0x5   : > { %s2332_s24 = smov (%p37_p1, %s35_s24), 0  ;;  %p294_p3 = pnand %p1824_p0, %p293_p2 }
   0x6   : > { %p345_p4 = scmp.lt.s32.totalorder (!%p294_p3), %s2046_s21, 1  ;;  %s2060_s8 = smov (!%p294_p3), 120  }
   0x7   : > { %297 = sbr.rel (%p294_p3) target bundleno = 1573 (0x625), region = 44  ;;  %s2061_s9 = smov (!%p294_p3), 112  }
   0x8   : > { %s2062_s10 = smov (!%p294_p3), 104   ;;  %s2063_s14 = smov (!%p294_p3), 8  }
   0x9   : > { %s2064_s15 = smov (!%p294_p3), 16   ;;  %s2065_s16 = smov (!%p294_p3), 24  }
   0xc   : > { %v2056_v0 = vmov 0.0   ;;  %vm2057_vm0 = vmmov 0   ;;  %s2334_s21 = smov (!%p345_p4, %s2046_s21), 1  ;;  %vm1001_vm1 = vcmask 64512   ;;  %vm389_vm2 = vcmask 7168  }
   0xd   : > { %1905 = vmatprep.subr.bf16.mxu0 %v2056_v0  ;;  %1907 = vmatprep.mubr.msk.bf16.mxu0 %vm2057_vm0, %v2056_v0  ;;  %s2128_s25 = sshll.u32 %s2334_s21, 2  ;;  %v2058_v4 = vmov -1e+09   ;;  %394 = vst.msk [vmem:[#allocation3] sm:$0xff] %vm389_vm2, %v2056_v0  ;;  %395 = vst.msk [vmem:[#allocation3 + $0x8] sm:$0xff] %vm389_vm2, %v2056_v0  ;;  %v993_v5 = vlaneseq  ;;  %v2059_v14 = vmov 0  }
   0xe   : > { %1911 = vmatprep.subr.bf16.mxu1 %v2056_v0  ;;  %1913 = vmatprep.mubr.msk.bf16.mxu1 %vm2057_vm0, %v2056_v0  ;;  %s2134_s28 = scalar_lea.vmem %s2323_s1, %s2128_s25  ;;  %s2141_s7 = scalar_lea.vmem %s2322_s0, %s2128_s25  ;;  %390 = vst.msk [vmem:[#allocation2] sm:$0xff] %vm389_vm2, %v2058_v4  ;;  %391 = vst.msk [vmem:[#allocation2 + $0x8] sm:$0xff] %vm389_vm2, %v2058_v4  ;;  %vm1084_vm4 = vcmask 1043456   ;;  %vm398_vm5 = vcmask 261120   ;;  %vm1280_vm6 = vcmask 130112   ;;  %vm1432_vm7 = vcmask 195712  }
   0xf   : > { %v1855_v1 = vld [vmem:[%s2134_s28 + $0x8] sm:$0xf]  ;;  %v998_v3 = vld [vmem:[%s2141_s7] sm:$0xf]  ;;  %392 = vst.msk [vmem:[#allocation2 + $0x10] sm:$0xff] %vm389_vm2, %v2058_v4  ;;  %393 = vst.msk [vmem:[#allocation2 + $0x18] sm:$0xff] %vm389_vm2, %v2058_v4  ;;  %1995 = vset.pattern.permute.xlu0 %v2059_v14  ;;  %1996 = vset.pattern.permute.xlu1 %v2059_v14  ;;  %s2197_s13 = scalar_lea.vmem %s2324_s2, %s2128_s25 }
  0x10   : > { %v1006_v2 = vsel %vm1001_vm1, %v1855_v1, 0  ;;  %396 = vst.msk [vmem:[#allocation3 + $0x10] sm:$0xff] %vm389_vm2, %v2056_v0  ;;  %397 = vst.msk [vmem:[#allocation3 + $0x18] sm:$0xff] %vm389_vm2, %v2056_v0  ;;  %v2161_v6 = vand.u32 127, %v993_v5  ;;  %v2163_v7 = vshrl.u32 %v993_v5, 7  ;;  %vm1584_vm8 = vcmask 261312  }
  0x11   : > { %1906 = vmatpush3.bf16.xpose.msra.mxu0 %v1006_v2  ;;  %v1997_v15 = vld [vmem:[%s2134_s28 + $0x8] ss:$0 sps:$4 sm:$0xff]   ;;  %v1998_v16 = vld [vmem:[%s2141_s7] ss:$0 sps:$4 sm:$0xff]   ;;  %v1856_v25 = vld [vmem:[%s2197_s13 + $0x10] sm:$0xf] }
  0x12   : > { %1923 = vmatprep.subr.bf16.mxu0 %v2056_v0  ;;  %vm997_vm3 = vcmp.le.s32.totalorder %v2161_v6, %v2163_v7  ;;  %1142 = vrot.lane.b32.xlu1 %v1997_v15, %s2060_s8  ;;  %v1999_v17 = vld [vmem:[%s2134_s28 + $0x8] ss:$0 sps:$4 sm:$0xff]   ;;  %v2000_v18 = vld [vmem:[%s2141_s7] ss:$0 sps:$4 sm:$0xff]   ;;  %v1086_v26 = vsel %vm1084_vm4, %v1856_v25, 0  ;;  %399 = vst.msk [vmem:[#allocation4] sm:$0xff] %vm398_vm5, %v2056_v0 }
  0x13   : > { %v2001_v19 = vld [vmem:[%s2134_s28 + $0x8] ss:$0 sps:$4 sm:$0xff]   ;;  %v2002_v20 = vld [vmem:[%s2141_s7] ss:$0 sps:$4 sm:$0xff]   ;;  %1912 = vmatpush3.bf16.msra.mxu1 %v1086_v26  ;;  %s1828_s25 = sshll.u32 %s2334_s21, 3 }
  0x14   : > { %1917 = vmatprep.subr.bf16.mxu1 %v2056_v0  ;;  %s376_s28 = scalar_lea.vmem %s2327_s5, %s1828_s25 }
  0x15   : > { %v2183_v21 = vld [vmem:[#allocation2] sm:$0xff]  ;;  %v1192_v63 = vld [vmem:[#allocation2 + $0x8] sm:$0xff] }
  0x16   : > { %1137 = vrot.lane.b32.xlu1 %v1998_v16, %s2060_s8  ;;  %v2240_v4 = vld [vmem:[#allocation2 + $0x10] sm:$0xff] }
  0x18   : > { %1908 = vmatmul.mubr.msk.bf16.vlgmr.msra.gmra.mxu0 %vm1001_vm1, %v998_v3  ;;  %v2003_v3 = vld [vmem:[%s2197_s13 + $0x10] ss:$0 sps:$4 sm:$0xff]  }
  0x19   : > { %1925 = vmatprep.mubr.msk.bf16.mxu0 %vm2057_vm0, %v2056_v0 }
  0x1a   : > { %1294 = vrot.lane.b32.xlu1 %v1999_v17, %s2061_s9 }
  0x1e   : > { %1289 = vrot.lane.b32.xlu1 %v2000_v18, %s2061_s9 }
  0x22   : > { %1446 = vrot.lane.b32.xlu1 %v2001_v19, %s2062_s10 }
  0x26   : > { %1441 = vrot.lane.b32.xlu1 %v2002_v20, %s2062_s10 }
  0x84   : > { %v1143_v30 = vpop.permute.xlu1 %1142 }
  0x85   : > { %v1148_v33 = vsel %vm1001_vm1, %v1143_v30, 0 }
  0x88   : > { %v1138_v31 = vpop.permute.xlu1 %1137 }
  0x8c   : > { %v1295_v35 = vpop.permute.xlu1 %1294 }
  0x8d   : > { %v1300_v37 = vsel %vm1001_vm1, %v1295_v35, 0 }
  0x90   : > { %v1290_v36 = vpop.permute.xlu1 %1289 }
  0x94   : > { %v1447_v38 = vpop.permute.xlu1 %1446 }
  0x95   : > { %v1452_v39 = vsel %vm1001_vm1, %v1447_v38, 0 }
  0x98   : > { %v1442_v40 = vpop.permute.xlu1 %1441 }
  0xd8   : > { %v1042_v8 = vpop.f32.mrf.mxu0 }
  0xd9   : > { %v1048_v9 = vsel %vm997_vm3, %v1042_v8, -1e+30  ;;  %v2246_v8 = vld [vmem:[#allocation2 + $0x18] sm:$0xff] }
  0xda   : > { %v1909_v10 = vpop.f32.mrf.mxu0  ;;  %v1050_v11 = vsel %vm1001_vm1, %v1048_v9, -inf }
  0xdb   : > { %1051 = vmax.xlane.f32.xlu0 %v1050_v11 }
  0xdc   : > { %v1045_v12 = vpop.f32.mrf.mxu0 }
  0xdd   : > { %v2004_v12 = vld [vmem:[%s2197_s13 + $0x10] ss:$0 sps:$4 sm:$0xff]  }
  0xde   : > { %v1910_v13 = vpop.f32.mrf.mxu0 }
  0xdf   : > { %v2005_v13 = vld [vmem:[%s2197_s13 + $0x10] ss:$0 sps:$4 sm:$0xff]  }
 0x164   : > { %v1052_v22 = vpop.xlane.xlu0 %1051 }
 0x165   : > { %v2186_v23 = vmax.f32 %v2183_v21, %v1052_v22 }
 0x167   : > { %v1054_v24 = vsub.f32 %v2183_v21, %v2186_v23  ;;  %1130 = vst.msk [vmem:[#allocation2] sm:$0xff] %vm389_vm2, %v2186_v23  ;;  %1059 = vperm.xlu0 %1995, %v2186_v23  }
 0x1e2   : > { %v1060_v27 = vpop.permute.xlu0 %1059 }
 0x1e3   : > { %v1062_v28 = vsub.f32 %v1048_v9, %v1060_v27 }
 0x1e5   : > { %v1063_v29 = vmul.f32 1.442695, %v1062_v28 }
 0x1e7   : > { %2008 = vpow2.f32 %v1063_v29 }
 0x1f4   : > { %v2202_v32 = vpop.eup %2008 }
 0x1f5   : > { %v1080_v34 = vpack.c.bf16 %v2202_v32, %v2202_v32  ;;  %v1067_v16 = vsel %vm1001_vm1, %v2202_v32, 0.0 }
 0x1f7   : > { %1914 = vmatmul.mubr.msk.bf16.vlgmr.msra.gmra.mxu1 %vm1001_vm1, %v1080_v34 }
 0x1f8   : > { %1918 = vmatpush3.bf16.xpose.msra.mxu1 %v1148_v33  ;;  %1919 = vmatprep.mubr.msk.bf16.mxu1 %vm2057_vm0, %v2056_v0 }
 0x1f9   : > { %1929 = vmatprep.subr.bf16.mxu1 %v2056_v0 }
 0x1ff   : > { %1920 = vmatmul.mubr.msk.bf16.vlgmr.msra.gmra.mxu1 %vm1001_vm1, %v1138_v31 }
 0x200   : > { %1930 = vmatpush3.bf16.xpose.msra.mxu1 %v1300_v37  ;;  %1931 = vmatprep.mubr.msk.bf16.mxu1 %vm2057_vm0, %v2056_v0 }
 0x201   : > { %1941 = vmatprep.subr.bf16.mxu1 %v2056_v0 }
 0x207   : > { %1932 = vmatmul.mubr.msk.bf16.vlgmr.msra.gmra.mxu1 %vm1001_vm1, %v1290_v36 }
 0x208   : > { %1942 = vmatpush3.bf16.xpose.msra.mxu1 %v1452_v39  ;;  %1943 = vmatprep.mubr.msk.bf16.mxu1 %vm2057_vm0, %v2056_v0 }
 0x209   : > { %1953 = vmatprep.subr.bf16.mxu1 %v2056_v0 }
 0x20f   : > { %1944 = vmatmul.mubr.msk.bf16.vlgmr.msra.gmra.mxu1 %vm1001_vm1, %v1442_v40 }
 0x210   : > { %1957 = vmatprep.mubr.msk.bf16.mxu1 %vm2057_vm0, %v2056_v0 }
 0x2b7   : > { %v2224_v41 = vpop.f32.mrf.mxu1 }
 0x2b9   : > { %v1915_v42 = vpop.f32.mrf.mxu1 }
 0x2bb   : > { %v1125_v43 = vpop.f32.mrf.mxu1 }
 0x2bc   : > { %v1055_v43 = vmul.f32 1.442695, %v1054_v24  ;;  %v1065_v24 = vld [vmem:[#allocation3] sm:$0xff] }
 0x2bd   : > { %v1916_v44 = vpop.f32.mrf.mxu1 }
 0x2bf   : > { %v1184_v45 = vpop.f32.mrf.mxu1 }
 0x2c0   : > { %v1190_v46 = vsel %vm997_vm3, %v1184_v45, -1e+30 }
 0x2c1   : > { %v1921_v47 = vpop.f32.mrf.mxu1  ;;  %v1193_v48 = vsel %vm1001_vm1, %v1190_v46, -inf }
 0x2c2   : > { %1194 = vmax.xlane.f32.xlu1 %v1193_v48 }
 0x2c3   : > { %v1187_v49 = vpop.f32.mrf.mxu1 }
 0x2c5   : > { %v1922_v50 = vpop.f32.mrf.mxu1 }
 0x2c7   : > { %v1336_v51 = vpop.f32.mrf.mxu1 }
 0x2c8   : > { %v1342_v52 = vsel %vm997_vm3, %v1336_v51, -1e+30 }
 0x2c9   : > { %v1933_v53 = vpop.f32.mrf.mxu1  ;;  %v1345_v54 = vsel %vm1001_vm1, %v1342_v52, -inf }
 0x2ca   : > { %1346 = vmax.xlane.f32.xlu0 %v1345_v54 }
 0x2cb   : > { %v1339_v55 = vpop.f32.mrf.mxu1 }
 0x2cc   : > { %v1209_v55 = vld [vmem:[#allocation3 + $0x8] sm:$0xff] }
 0x2cd   : > { %v1934_v56 = vpop.f32.mrf.mxu1 }
 0x2cf   : > { %v1488_v57 = vpop.f32.mrf.mxu1 }
 0x2d0   : > { %v1494_v58 = vsel %vm997_vm3, %v1488_v57, -1e+30 }
 0x2d1   : > { %v1945_v59 = vpop.f32.mrf.mxu1  ;;  %v1497_v60 = vsel %vm1001_vm1, %v1494_v58, -inf }
 0x2d2   : > { %1498 = vmax.xlane.f32.xlu1 %v1497_v60  ;;  %v1361_v59 = vld [vmem:[#allocation3 + $0x10] sm:$0xff] }
 0x2d3   : > { %v1491_v61 = vpop.f32.mrf.mxu1 }
 0x2d5   : > { %v1946_v62 = vpop.f32.mrf.mxu1 }
 0x34b   : > { %v1195_v1 = vpop.xlane.xlu1 %1194 }
 0x34c   : > { %v1196_v2 = vmax.f32 %v1192_v63, %v1195_v1  ;;  %v1513_v1 = vld [vmem:[#allocation3 + $0x18] sm:$0xff] }
 0x34e   : > { %1282 = vst.msk [vmem:[#allocation2 + $0x8] sm:$0xff] %vm389_vm2, %v1196_v2  ;;  %1202 = vperm.xlu1 %1996, %v1196_v2   ;;  %v1197_v14 = vsub.f32 %v1192_v63, %v1196_v2  ;;  %v1073_v2 = vld [vmem:[#allocation4] sm:$0xff] }
 0x350   : > { %v1198_v15 = vmul.f32 1.442695, %v1197_v14 }
 0x352   : > { %1227 = vrot.lane.b32.xlu1 %v2003_v3, %s2060_s8  ;;  %2010 = vpow2.f32 %v1198_v15 }
 0x353   : > { %v1347_v5 = vpop.xlane.xlu0 %1346 }
 0x354   : > { %v1348_v6 = vmax.f32 %v2240_v4, %v1347_v5 }
 0x356   : > { %v1349_v7 = vsub.f32 %v2240_v4, %v1348_v6  ;;  %1434 = vst.msk [vmem:[#allocation2 + $0x10] sm:$0xff] %vm389_vm2, %v1348_v6  ;;  %1354 = vperm.xlu0 %1995, %v1348_v6  }
 0x358   : > { %v1350_v47 = vmul.f32 1.442695, %v1349_v7 }
 0x35b   : > { %v1499_v9 = vpop.xlane.xlu1 %1498 }
 0x35c   : > { %v1500_v10 = vmax.f32 %v2246_v8, %v1499_v9 }
 0x35e   : > { %v1501_v11 = vsub.f32 %v2246_v8, %v1500_v10  ;;  %1586 = vst.msk [vmem:[#allocation2 + $0x18] sm:$0xff] %vm389_vm2, %v1500_v10  ;;  %1506 = vperm.xlu1 %1996, %v1500_v10  }
 0x35f   : > { %v2257_v17 = vpop.eup %2010 }
 0x360   : > { %v1502_v48 = vmul.f32 1.442695, %v1501_v11  ;;  %v1210_v56 = vmul.f32 %v2257_v17, %v1209_v55 }
 0x362   : > { %1379 = vrot.lane.b32.xlu1 %v2004_v12, %s2061_s9  ;;  %s382_s9 = scalar_lea.vmem %s2328_s6, %s1828_s25 }
 0x366   : > { %1531 = vrot.lane.b32.xlu1 %v2005_v13, %s2062_s10 }
 0x38a   : > { %1068 = vadd.xlane.f32.xlu1 %v1067_v16 }
 0x39b   : > { %1219 = vperm.xlu1 %1996, %v2257_v17  }
 0x3c9   : > { %v1203_v18 = vpop.permute.xlu1 %1202 }
 0x3ca   : > { %v1205_v19 = vsub.f32 %v1190_v46, %v1203_v18 }
 0x3cc   : > { %v1206_v20 = vmul.f32 1.442695, %v1205_v19 }
 0x3cd   : > { %v1228_v22 = vpop.permute.xlu1 %1227 }
 0x3ce   : > { %2012 = vpow2.f32 %v1206_v20  ;;  %v1233_v25 = vsel %vm1084_vm4, %v1228_v22, 0 }
 0x3cf   : > { %1924 = vmatpush3.bf16.msra.mxu0 %v1233_v25 }
 0x3d0   : > { %1935 = vmatprep.subr.bf16.mxu0 %v2056_v0 }
 0x3d1   : > { %v1355_v26 = vpop.permute.xlu0 %1354 }
 0x3d2   : > { %v1357_v27 = vsub.f32 %v1342_v52, %v1355_v26 }
 0x3d4   : > { %v1358_v28 = vmul.f32 1.442695, %v1357_v27 }
 0x3d6   : > { %2014 = vpow2.f32 %v1358_v28 }
 0x3d9   : > { %v1507_v29 = vpop.permute.xlu1 %1506 }
 0x3da   : > { %v1509_v30 = vsub.f32 %v1494_v58, %v1507_v29  ;;  %v2006_v29 = vld [vmem:[%s2325_s3 + $0x8] sm:$0xff]  }
 0x3db   : > { %v2013_v31 = vpop.eup %2012  ;;  %1954 = vmatpush3.bf16.msra.mxu1 %v2006_v29 }
 0x3dc   : > { %v1510_v32 = vmul.f32 1.442695, %v1509_v30  ;;  %v1211_v33 = vsel %vm1001_vm1, %v2013_v31, 0.0  ;;  %v1223_v34 = vpack.c.bf16 %v2013_v31, %v2013_v31  ;;  %v2007_v30 = vld [vmem:[%s2325_s3] sm:$0xff]   ;;  %1955 = vmatprep.subr.bf16.mxu1 %v2056_v0 }
 0x3dd   : > { %1212 = vadd.xlane.f32.xlu0 %v1211_v33  ;;  %v1380_v35 = vpop.permute.xlu1 %1379 }
 0x3de   : > { %2016 = vpow2.f32 %v1510_v32  ;;  %1926 = vmatmul.mubr.msk.bf16.vlgmr.msra.gmra.mxu0 %vm1001_vm1, %v1223_v34  ;;  %v1385_v36 = vsel %vm1084_vm4, %v1380_v35, 0 }
 0x3df   : > { %1936 = vmatpush3.bf16.msra.mxu0 %v1385_v36  ;;  %1937 = vmatprep.mubr.msk.bf16.mxu0 %vm2057_vm0, %v2056_v0  ;;  %2018 = vpow2.f32 %v1055_v43 }
 0x3e0   : > { %1947 = vmatprep.subr.bf16.mxu0 %v2056_v0  ;;  %2020 = vpow2.f32 %v1350_v47  ;;  %1956 = vmatpush3.bf16.msra.mxu1 %v2007_v30 }
 0x3e1   : > { %v1532_v37 = vpop.permute.xlu1 %1531  ;;  %2022 = vpow2.f32 %v1502_v48 }
 0x3e2   : > { %v1537_v42 = vsel %vm1084_vm4, %v1532_v37, 0 }
 0x3e3   : > { %v2015_v38 = vpop.eup %2014 }
 0x3e4   : > { %v1363_v39 = vsel %vm1001_vm1, %v2015_v38, 0.0  ;;  %v1375_v40 = vpack.c.bf16 %v2015_v38, %v2015_v38 }
 0x3e5   : > { %1364 = vadd.xlane.f32.xlu0 %v1363_v39 }
 0x3e6   : > { %1938 = vmatmul.mubr.msk.bf16.vlgmr.msra.gmra.mxu0 %vm1001_vm1, %v1375_v40 }
 0x3e7   : > { %1948 = vmatpush3.bf16.msra.mxu0 %v1537_v42  ;;  %1949 = vmatprep.mubr.msk.bf16.mxu0 %vm2057_vm0, %v2056_v0 }
 0x3eb   : > { %v2017_v44 = vpop.eup %2016 }
 0x3ec   : > { %v1515_v45 = vsel %vm1001_vm1, %v2017_v44, 0.0  ;;  %v1527_v46 = vpack.c.bf16 %v2017_v44, %v2017_v44  ;;  %v2019_v49 = vpop.eup %2018 }
 0x3ed   : > { %1516 = vadd.xlane.f32.xlu1 %v1515_v45  ;;  %v2021_v21 = vpop.eup %2020  ;;  %v1066_v50 = vmul.f32 %v2019_v49, %v1065_v24 }
 0x3ee   : > { %1950 = vmatmul.mubr.msk.bf16.vlgmr.msra.gmra.mxu0 %vm1001_vm1, %v1527_v46  ;;  %v2023_v23 = vpop.eup %2022  ;;  %v1362_v60 = vmul.f32 %v2021_v21, %v1361_v59 }
 0x3ef   : > { %v1514_v3 = vmul.f32 %v2023_v23, %v1513_v1 }
 0x3fb   : > { %1076 = vperm.xlu0 %1995, %v2019_v49  }
 0x3ff   : > { %1371 = vperm.xlu0 %1995, %v2021_v21  }
 0x403   : > { %1523 = vperm.xlu0 %1995, %v2023_v23  }
 0x413   : > { %v1069_v51 = vpop.xlane.xlu1 %1068 }
 0x414   : > { %v1070_v52 = vadd.f32 %v1069_v51, %v1066_v50 }
 0x416   : > { %1072 = vst.msk [vmem:[#allocation3] sm:$0xff] %vm389_vm2, %v1070_v52 }
 0x417   : > { %v1220_v63 = vpop.permute.xlu1 %1219 }
 0x41d   : > { %v1591_v53 = vld [vmem:[#allocation3] sm:$0xff] }
 0x41e   : > { %2024 = vrcp.f32 %v1591_v53 }
 0x42b   : > { %v2025_v54 = vpop.eup %2024 }
 0x42c   : > { %1595 = vperm.xlu0 %1995, %v2025_v54  }
 0x466   : > { %v1213_v57 = vpop.xlane.xlu0 %1212 }
 0x467   : > { %v1214_v58 = vadd.f32 %v1213_v57, %v1210_v56  ;;  %v1639_v56 = vld [vmem:[%s376_s28] sm:$0xff] }
 0x468   : > { %v1880_v57 = vld [vmem:[%s2326_s4] ss:$0 sm:$0xff] }
 0x469   : > { %1215 = vst.msk [vmem:[#allocation3 + $0x8] sm:$0xff] %vm389_vm2, %v1214_v58  ;;  %v1647_v58 = vadd.f32 %v1880_v57, %v1639_v56 }
 0x46e   : > { %v1365_v61 = vpop.xlane.xlu0 %1364 }
 0x46f   : > { %v1366_v62 = vadd.f32 %v1365_v61, %v1362_v60 }
 0x470   : > { %v1603_v14 = vld [vmem:[#allocation3 + $0x8] sm:$0xff] }
 0x471   : > { %1367 = vst.msk [vmem:[#allocation3 + $0x10] sm:$0xff] %vm389_vm2, %v1366_v62 }
 0x476   : > { %v1517_v4 = vpop.xlane.xlu1 %1516  ;;  %v1077_v5 = vpop.permute.xlu0 %1076 }
 0x477   : > { %v1518_v6 = vadd.f32 %v1517_v4, %v1514_v3  ;;  %v1079_v7 = vmul.f32 %v1077_v5, %v1073_v2 }
 0x478   : > { %v1615_v8 = vld [vmem:[#allocation3 + $0x10] sm:$0xff] }
 0x479   : > { %1519 = vst.msk [vmem:[#allocation3 + $0x18] sm:$0xff] %vm389_vm2, %v1518_v6  ;;  %v1128_v9 = vadd.f32 %v2224_v41, %v1079_v7  ;;  %2026 = vrcp.f32 %v1615_v8 }
 0x47a   : > { %2028 = vrcp.f32 %v1603_v14  ;;  %v1372_v35 = vpop.permute.xlu0 %1371 }
 0x47b   : > { %1129 = vst.msk [vmem:[#allocation4] sm:$0xff] %vm1001_vm1, %v1128_v9 }
 0x47e   : > { %v1524_v40 = vpop.permute.xlu0 %1523 }
 0x480   : > { %v1627_v17 = vld [vmem:[#allocation3 + $0x18] sm:$0xff] }
 0x481   : > { %2030 = vrcp.f32 %v1627_v17 }
 0x482   : > { %v1216_v31 = vld [vmem:[#allocation4] sm:$0xff] }
 0x483   : > { %v1222_v32 = vmul.f32 %v1220_v63, %v1216_v31 }
 0x486   : > { %v2027_v10 = vpop.eup %2026 }
 0x487   : > { %1619 = vperm.xlu0 %1995, %v2027_v10   ;;  %v2029_v25 = vpop.eup %2028 }
 0x48e   : > { %v2031_v28 = vpop.eup %2030 }
 0x49e   : > { %v1269_v11 = vpop.f32.mrf.mxu0 }
 0x49f   : > { %1276 = vrot.lane.b32.xlu1 %v1269_v11, %s2063_s14 }
 0x4a0   : > { %v1927_v12 = vpop.f32.mrf.mxu0 }
 0x4a2   : > { %v1272_v13 = vpop.f32.mrf.mxu0 }
 0x4a4   : > { %v1928_v15 = vpop.f32.mrf.mxu0 }
 0x4a6   : > { %v1421_v16 = vpop.f32.mrf.mxu0 }
 0x4a7   : > { %1428 = vrot.lane.b32.xlu1 %v1421_v16, %s2064_s15  ;;  %v1596_v45 = vpop.permute.xlu0 %1595 }
 0x4a8   : > { %v1939_v18 = vpop.f32.mrf.mxu0 }
 0x4aa   : > { %v1424_v41 = vpop.f32.mrf.mxu0 }
 0x4ac   : > { %v1940_v19 = vpop.f32.mrf.mxu0 }
 0x4ae   : > { %v1573_v20 = vpop.f32.mrf.mxu0 }
 0x4af   : > { %1580 = vrot.lane.b32.xlu1 %v1573_v20, %s2065_s16 }
 0x4b0   : > { %v1951_v22 = vpop.f32.mrf.mxu0 }
 0x4b2   : > { %v1576_v26 = vpop.f32.mrf.mxu0 }
 0x4b3   : > { %1607 = vperm.xlu1 %1996, %v2029_v25  }
 0x4b4   : > { %v1952_v27 = vpop.f32.mrf.mxu0 }
 0x4b7   : > { %1631 = vperm.xlu1 %1996, %v2031_v28  }
 0x502   : > { %v1620_v23 = vpop.permute.xlu0 %1619 }
 0x511   : > { %v1277_v33 = vpop.permute.xlu1 %1276 }
 0x512   : > { %v1279_v34 = vadd.f32 %v1277_v33, %v1222_v32 }
 0x514   : > { %1281 = vst.msk [vmem:[#allocation4] sm:$0xff] %vm1280_vm6, %v1279_v34 }
 0x519   : > { %v1429_v38 = vpop.permute.xlu1 %1428 }
 0x51b   : > { %v1368_v36 = vld [vmem:[#allocation4] sm:$0xff] }
 0x51c   : > { %v1374_v37 = vmul.f32 %v1372_v35, %v1368_v36 }
 0x51e   : > { %v1431_v39 = vadd.f32 %v1429_v38, %v1374_v37 }
 0x520   : > { %1433 = vst.msk [vmem:[#allocation4] sm:$0xff] %vm1432_vm7, %v1431_v39 }
 0x521   : > { %v1581_v0 = vpop.permute.xlu1 %1580 }
 0x527   : > { %v1520_v42 = vld [vmem:[#allocation4] sm:$0xff] }
 0x528   : > { %v1526_v43 = vmul.f32 %v1524_v40, %v1520_v42 }
 0x52a   : > { %v1583_v44 = vadd.f32 %v1581_v0, %v1526_v43 }
 0x52c   : > { %1585 = vst.msk [vmem:[#allocation4] sm:$0xff] %vm1584_vm8, %v1583_v44 }
 0x52e   : > { %v1608_v49 = vpop.permute.xlu1 %1607 }
 0x532   : > { %v1632_v52 = vpop.permute.xlu1 %1631 }
 0x533   : > { %v1590_v46 = vld [vmem:[#allocation4] sm:$0xff] }
 0x534   : > { %v1598_v47 = vmul.f32 %v1596_v45, %v1590_v46 }
 0x536   : > { %1600 = vst.msk [vmem:[#allocation4] sm:$0xff] %vm1001_vm1, %v1598_v47 }
 0x53d   : > { %v1601_v48 = vld [vmem:[#allocation4] sm:$0xff] }
 0x53e   : > { %v1610_v21 = vmul.f32 %v1608_v49, %v1601_v48 }
 0x540   : > { %1612 = vst.msk [vmem:[#allocation4] sm:$0xff] %vm1280_vm6, %v1610_v21 }
 0x547   : > { %v1613_v24 = vld [vmem:[#allocation4] sm:$0xff] }
 0x548   : > { %v1622_v50 = vmul.f32 %v1620_v23, %v1613_v24 }
 0x54a   : > { %1624 = vst.msk [vmem:[#allocation4] sm:$0xff] %vm1432_vm7, %v1622_v50 }
 0x551   : > { %v1625_v51 = vld [vmem:[#allocation4] sm:$0xff] }
 0x552   : > { %v1634_v53 = vmul.f32 %v1632_v52, %v1625_v51 }
 0x554   : > { %1636 = vst.msk [vmem:[#allocation4] sm:$0xff] %vm1584_vm8, %v1634_v53 }
 0x55b   : > { %v1637_v54 = vld [vmem:[#allocation4] sm:$0xff] }
 0x55c   : > { %v1638_v55 = vpack.c.bf16 %v1637_v54, %v1637_v54 }
 0x55e   : > { %1958 = vmatmul.mubr.msk.bf16.vlgmr.msra.gmra.mxu1 %vm398_vm5, %v1638_v55 }
 0x61e   : > { %v1702_v59 = vpop.f32.mrf.mxu1 }
 0x61f   : > { %v1708_v60 = vadd.f32 %v1702_v59, %v1647_v58 }
 0x620   : > { %v1959_v61 = vpop.f32.mrf.mxu1 }
 0x621   : > { %1709 = vst.msk [vmem:[%s382_s9] sm:$0xff] %vm398_vm5, %v1708_v60 }
 0x622   : > { %v1705_v62 = vpop.f32.mrf.mxu1 }
 0x624   : > { %v1960_v63 = vpop.f32.mrf.mxu1 }
 0x625 PF: > { %s16_s23 = sadd.s32 1, %s2054_s23   ;;  %s2329_s21 = smov %s2050_s22 }
 0x626   : > { %p13_p5 = scmp.ge.s32.totalorder %s16_s23, 4   ;;  %s2330_s22 = smov %s2332_s24 }
 0x628   :  { %15 = sbr.rel (!%p13_p5) target bundleno = 2 (0x2), region = 114 }

</bundles_post_ra>
